<compile_context>
chip_gen: v7x
topology: tpu7x:2x2x1
jax: 0.10.0
libtpu: 0.0.40
codegen_flags: <defaults>
</compile_context>

<pallas_src>
import math

import jax
import jax.numpy as jnp
from jax.experimental import pallas as pl
from jax.experimental.pallas import tpu as pltpu

# ----------------------------- configuration ------------------------------ #
IMAGE_SIZE = 16
CHANNELS = 3
NUM_CLASSES = 10
DIM = 32
DEPTH = 2
HEADS = 2
DIM_HEAD = 16
MLP_DIM = 64
POOL = "cls"
T2T_LAYERS = ((3, 2), (3, 2))   # (kernel_size, stride) per T2T stage
LN_EPS = 1e-5


def conv_output_size(image_size, kernel_size, stride, padding):
    return int((image_size - kernel_size + 2 * padding) / stride + 1)


def _round_up(x, m):
    return ((x + m - 1) // m) * m


def _layernorm(x, g, b):
    """PyTorch nn.LayerNorm semantics (eps=1e-5, biased variance), f32 math."""
    mean = jnp.mean(x, axis=-1, keepdims=True)
    c = x - mean
    var = jnp.mean(c * c, axis=-1, keepdims=True)
    return c * jax.lax.rsqrt(var + LN_EPS) * g + b


# ----------------------- fused transformer kernel -------------------------- #
def _make_transformer_kernel(heads, dim_head, has_proj):
    """One grid step = one transformer block applied to one batch element."""
    scale = dim_head ** -0.5

    def kernel(*refs):
        if has_proj:
            (x_ref, ln1g, ln1b, qkv_w, out_w, out_b,
             ln2g, ln2b, ff1_w, ff1_b, ff2_w, ff2_b, o_ref) = refs
        else:
            (x_ref, ln1g, ln1b, qkv_w,
             ln2g, ln2b, ff1_w, ff1_b, ff2_w, ff2_b, o_ref) = refs
            out_w = out_b = None

        j = pl.program_id(1)                 # depth index ("arbitrary" axis)

        @pl.when(j == 0)
        def _():                             # seed the carried residual stream
            o_ref[...] = x_ref[...]

        x = o_ref[...]                       # (n, d) f32 residual stream

        # ---- attention: LN -> per-head QKV -> softmax(QK^T)V -> proj -> +res
        xn = _layernorm(x, ln1g[...], ln1b[...]).astype(jnp.bfloat16)
        attn = out_b[...] if has_proj else None
        for h in range(heads):               # static unroll (heads = 1 or 2)
            q = jnp.dot(xn, qkv_w[h], preferred_element_type=jnp.float32)
            k = jnp.dot(xn, qkv_w[heads + h], preferred_element_type=jnp.float32)
            v = jnp.dot(xn, qkv_w[2 * heads + h], preferred_element_type=jnp.float32)
            s = jax.lax.dot_general(
                q.astype(jnp.bfloat16), k.astype(jnp.bfloat16),
                (((1,), (1,)), ((), ())),
                preferred_element_type=jnp.float32) * scale
            m = jnp.max(s, axis=-1, keepdims=True)
            e = jnp.exp(s - m)
            p = e * pl.reciprocal(jnp.sum(e, axis=-1, keepdims=True), approx=True)
            o_h = jnp.dot(p.astype(jnp.bfloat16), v.astype(jnp.bfloat16),
                          preferred_element_type=jnp.float32)
            if has_proj:
                # concat(o_0, o_1) @ W_out  ==  sum_h  o_h @ W_out[h]
                attn = attn + jnp.dot(o_h.astype(jnp.bfloat16), out_w[h],
                                      preferred_element_type=jnp.float32)
            else:
                attn = o_h                   # project_out=False => heads == 1
        x = x + attn

        # ---- feed-forward: LN -> Linear -> GELU -> Linear -> +res
        xn = _layernorm(x, ln2g[...], ln2b[...]).astype(jnp.bfloat16)
        h1 = jnp.dot(xn, ff1_w[...], preferred_element_type=jnp.float32) + ff1_b[...]
        # TODO(synk): nn.GELU() in PyTorch is the exact erf GELU; the tanh
        # approximation is used in-kernel (per perf review / EUP lowering).
        h1 = jax.nn.gelu(h1, approximate=True).astype(jnp.bfloat16)
        h2 = jnp.dot(h1, ff2_w[...], preferred_element_type=jnp.float32) + ff2_b[...]
        o_ref[...] = x + h2                  # carried to next depth step

    return kernel


def pallas_transformer(x, p, *, heads, dim_head):
    """Runs an entire pre-norm Transformer (all depth blocks) in ONE pallas_call.

    x: (b, n, d) f32.  p: dict of per-depth stacked parameters (see
    make_transformer_params).  grid = (batch, depth): batch is "parallel",
    depth is "arbitrary" and the output block is the carried residual stream.
    """
    b, n, d = x.shape
    depth = p["qkv_w"].shape[0]
    has_proj = "out_w" in p

    x_spec = pl.BlockSpec((None, n, d), lambda i, j: (i, 0, 0))

    def per_depth(arr):
        """Per-depth parameter: block = full extent of every non-depth dim."""
        nd = arr.ndim - 1
        return pl.BlockSpec((None,) + arr.shape[1:], lambda i, j: (j,) + (0,) * nd)

    in_specs = [x_spec, per_depth(p["ln1_g"]), per_depth(p["ln1_b"]),
                per_depth(p["qkv_w"])]
    args = [x, p["ln1_g"], p["ln1_b"], p["qkv_w"]]
    if has_proj:
        in_specs += [per_depth(p["out_w"]), per_depth(p["out_b"])]
        args += [p["out_w"], p["out_b"]]
    in_specs += [per_depth(p["ln2_g"]), per_depth(p["ln2_b"]),
                 per_depth(p["ff1_w"]), per_depth(p["ff1_b"]),
                 per_depth(p["ff2_w"]), per_depth(p["ff2_b"])]
    args += [p["ln2_g"], p["ln2_b"], p["ff1_w"], p["ff1_b"], p["ff2_w"], p["ff2_b"]]

    return pl.pallas_call(
        _make_transformer_kernel(heads, dim_head, has_proj),
        out_shape=jax.ShapeDtypeStruct((b, n, d), jnp.float32),
        grid=(b, depth),
        in_specs=in_specs,
        out_specs=x_spec,
        compiler_params=pltpu.CompilerParams(
            dimension_semantics=("parallel", "arbitrary")),
    )(*args)


# ------------------------- patch-embedding linear -------------------------- #
def _linear_kernel(x_ref, w_ref, b_ref, o_ref):
    o_ref[...] = jnp.dot(x_ref[...].astype(jnp.bfloat16), w_ref[...],
                         preferred_element_type=jnp.float32) + b_ref[...]


def pallas_linear(x, w, bias):
    """x: (M, K) f32, w: (K, N) bf16, bias: (1, N) f32 -> (M, N) f32.

    No wrapper padding: full-extent K / N blocks are legal; ragged M is handled
    by a cdiv grid.
    """
    M, K = x.shape
    N = w.shape[1]
    TM = min(128, _round_up(M, 8))
    return pl.pallas_call(
        _linear_kernel,
        out_shape=jax.ShapeDtypeStruct((M, N), jnp.float32),
        grid=(pl.cdiv(M, TM),),
        in_specs=[pl.BlockSpec((TM, K), lambda i: (i, 0)),
                  pl.BlockSpec((K, N), lambda i: (0, 0)),
                  pl.BlockSpec((1, N), lambda i: (0, 0))],
        out_specs=pl.BlockSpec((TM, N), lambda i: (i, 0)),
        compiler_params=pltpu.CompilerParams(dimension_semantics=("parallel",)),
    )(x, w, bias)


# ------------------------------- JAX glue ---------------------------------- #
def unfold(x, kernel_size, stride, padding):
    """nn.Unfold: (b, c, h, w) -> (b, c*k*k, L), channel-major (c, kh, kw) order."""
    k, s, p = kernel_size, stride, padding
    patches = jax.lax.conv_general_dilated_patches(
        x, filter_shape=(k, k), window_strides=(s, s),
        padding=((p, p), (p, p)),
        dimension_numbers=("NCHW", "OIHW", "NCHW"))        # (b, c*k*k, oh, ow)
    b, ckk = patches.shape[:2]
    return patches.reshape(b, ckk, -1)


@jax.jit
def t2t_vit_forward(img, params):
    x = img.astype(jnp.float32)                            # (b, c, h, w) NCHW
    for i, (k, s) in enumerate(T2T_LAYERS):
        if i > 0:
            # RearrangeImage: 'b (h w) c -> b c h w'
            b, n, c = x.shape
            hh = int(math.sqrt(n))
            x = x.reshape(b, hh, hh, c).transpose(0, 3, 1, 2)
        x = unfold(x, k, s, s // 2)                        # (b, c*k*k, L)
        x = jnp.transpose(x, (0, 2, 1))                    # 'b c n -> b n c'
        if params["t2t"][i] is not None:
            # T2T transformers: heads=1, dim_head=dim=layer_dim, no out proj.
            x = pallas_transformer(x, params["t2t"][i],
                                   heads=1, dim_head=x.shape[-1])

    b, n, cdim = x.shape
    x = pallas_linear(x.reshape(b * n, cdim), params["patch_w"], params["patch_b"])
    x = x.reshape(b, n, DIM)

    cls = jnp.broadcast_to(params["cls_token"], (b, 1, DIM))
    x = jnp.concatenate([cls, x], axis=1)
    x = x + params["pos_embedding"][:, : n + 1]
    # nn.Dropout(emb_dropout=0) / eval mode is an identity; omitted.

    x = pallas_transformer(x, params["main"], heads=HEADS, dim_head=DIM_HEAD)

    x = jnp.mean(x, axis=1) if POOL == "mean" else x[:, 0]   # (b, DIM)

    # Classifier head kept in plain XLA: a pallas_call on a 2x10 output is
    # pure launch overhead (perf review).
    x = _layernorm(x, params["head_ln_g"], params["head_ln_b"])
    return jnp.dot(x, params["head_w"]) + params["head_b"]


# ---------------------------- parameter building --------------------------- #
def key_stream(seed):
    key = jax.random.PRNGKey(seed)
    while True:
        key, sub = jax.random.split(key)
        yield sub


def make_transformer_params(ks, dim, depth, heads, dim_head, mlp_dim):
    inner = heads * dim_head
    project_out = not (heads == 1 and dim_head == dim)

    def winit(shape):
        return 0.02 * jax.random.normal(next(ks), shape, jnp.float32)

    # to_qkv weight generated in PyTorch layout (dim, 3*inner) then rearranged
    # to (3*heads, dim, dim_head) slabs so the kernel indexes heads on a
    # leading ref dim (no in-kernel lane slicing).
    qkv = winit((depth, dim, 3 * inner))
    qkv = qkv.reshape(depth, dim, 3, heads, dim_head)
    qkv = qkv.transpose(0, 2, 3, 1, 4).reshape(depth, 3 * heads, dim, dim_head)

    p = {
        "ln1_g": jnp.ones((depth, 1, dim), jnp.float32),
        "ln1_b": jnp.zeros((depth, 1, dim), jnp.float32),
        "qkv_w": qkv.astype(jnp.bfloat16),
        "ln2_g": jnp.ones((depth, 1, dim), jnp.float32),
        "ln2_b": jnp.zeros((depth, 1, dim), jnp.float32),
        "ff1_w": winit((depth, dim, mlp_dim)).astype(jnp.bfloat16),
        "ff1_b": jnp.zeros((depth, 1, mlp_dim), jnp.float32),
        "ff2_w": winit((depth, mlp_dim, dim)).astype(jnp.bfloat16),
        "ff2_b": jnp.zeros((depth, 1, dim), jnp.float32),
    }
    if project_out:
        out_w = winit((depth, inner, dim)).reshape(depth, heads, dim_head, dim)
        p["out_w"] = out_w.astype(jnp.bfloat16)
        p["out_b"] = jnp.zeros((depth, 1, dim), jnp.float32)
    return p


def build_params(ks):
    params = {"t2t": []}
    layer_dim = CHANNELS
    out_img = IMAGE_SIZE
    for i, (k, s) in enumerate(T2T_LAYERS):
        layer_dim *= k ** 2
        out_img = conv_output_size(out_img, k, s, s // 2)
        if i < len(T2T_LAYERS) - 1:
            params["t2t"].append(
                make_transformer_params(ks, layer_dim, 1, 1, layer_dim, layer_dim))
        else:
            params["t2t"].append(None)   # last T2T stage has Identity transformer

    params["patch_w"] = (0.02 * jax.random.normal(
        next(ks), (layer_dim, DIM), jnp.float32)).astype(jnp.bfloat16)
    params["patch_b"] = jnp.zeros((1, DIM), jnp.float32)
    params["pos_embedding"] = jax.random.normal(
        next(ks), (1, out_img ** 2 + 1, DIM), jnp.float32)
    params["cls_token"] = jax.random.normal(next(ks), (1, 1, DIM), jnp.float32)
    params["main"] = make_transformer_params(ks, DIM, DEPTH, HEADS, DIM_HEAD, MLP_DIM)
    params["head_ln_g"] = jnp.ones((DIM,), jnp.float32)
    params["head_ln_b"] = jnp.zeros((DIM,), jnp.float32)
    params["head_w"] = 0.02 * jax.random.normal(next(ks), (DIM, NUM_CLASSES), jnp.float32)
    params["head_b"] = jnp.zeros((NUM_CLASSES,), jnp.float32)
    return params


# ----------------------------------- main ----------------------------------- #
if __name__ == "__main__":
    ks = key_stream(0)
    params = build_params(ks)

    img = jax.random.normal(jax.random.PRNGKey(0),
                            (2, CHANNELS, IMAGE_SIZE, IMAGE_SIZE),
                            jnp.float32)  # layout: NCHW

    logits = t2t_vit_forward(img, params)
    jax.block_until_ready(logits)

    assert logits.shape == (2, NUM_CLASSES), logits.shape
    assert logits.dtype == jnp.float32
    assert bool(jnp.all(jnp.isfinite(logits)))
    print("KERNEL_OK")
</pallas_src>

<mosaic_0001>
module attributes {stable_mosaic.version = 11 : i64} {
  func.func @kernel(%arg0: i32, %arg1: i32, %arg2: memref<1x64x27xf32, #tpu.memory_space<vmem>>, %arg3: memref<1x1x27xf32, #tpu.memory_space<vmem>>, %arg4: memref<1x1x27xf32, #tpu.memory_space<vmem>>, %arg5: memref<1x3x27x27xbf16, #tpu.memory_space<vmem>>, %arg6: memref<1x1x27xf32, #tpu.memory_space<vmem>>, %arg7: memref<1x1x27xf32, #tpu.memory_space<vmem>>, %arg8: memref<1x27x27xbf16, #tpu.memory_space<vmem>>, %arg9: memref<1x1x27xf32, #tpu.memory_space<vmem>>, %arg10: memref<1x27x27xbf16, #tpu.memory_space<vmem>>, %arg11: memref<1x1x27xf32, #tpu.memory_space<vmem>>, %arg12: memref<1x64x27xf32, #tpu.memory_space<vmem>>) attributes {dimension_semantics = [#tpu.dimension_semantics<parallel>, #tpu.dimension_semantics<arbitrary>], iteration_bounds = array<i64: 2, 1>, scalar_prefetch = 0 : i64, scratch_operands = 0 : i64, tpu.core_type = #tpu.core_type<tc>, window_params = [{transform_indices = @transform_0, window_bounds = array<i64: 1, 64, 27>}, {transform_indices = @transform_1, window_bounds = array<i64: 1, 1, 27>}, {transform_indices = @transform_2, window_bounds = array<i64: 1, 1, 27>}, {transform_indices = @transform_3, window_bounds = array<i64: 1, 3, 27, 27>}, {transform_indices = @transform_4, window_bounds = array<i64: 1, 1, 27>}, {transform_indices = @transform_5, window_bounds = array<i64: 1, 1, 27>}, {transform_indices = @transform_6, window_bounds = array<i64: 1, 27, 27>}, {transform_indices = @transform_7, window_bounds = array<i64: 1, 1, 27>}, {transform_indices = @transform_8, window_bounds = array<i64: 1, 27, 27>}, {transform_indices = @transform_9, window_bounds = array<i64: 1, 1, 27>}, {transform_indices = @transform_10, window_bounds = array<i64: 1, 64, 27>}]} {
    %c0_i32 = arith.constant 0 : i32
    %0 = arith.cmpi eq, %arg1, %c0_i32 : i32
    %1 = arith.extui %0 : i1 to i32
    %c0_i32_0 = arith.constant 0 : i32
    %2 = arith.cmpi ne, %1, %c0_i32_0 : i32
    scf.if %2 {
      %c0_63 = arith.constant 0 : index
      %c0_64 = arith.constant 0 : index
      %c0_65 = arith.constant 0 : index
      %115 = vector.load %arg2[%c0_63, %c0_64, %c0_65] : memref<1x64x27xf32, #tpu.memory_space<vmem>>, vector<1x64x27xf32>
      %116 = vector.shape_cast %115 : vector<1x64x27xf32> to vector<64x27xf32>
      %c0_66 = arith.constant 0 : index
      %c0_67 = arith.constant 0 : index
      %c0_68 = arith.constant 0 : index
      %117 = vector.load %arg12[%c0_66, %c0_67, %c0_68] : memref<1x64x27xf32, #tpu.memory_space<vmem>>, vector<1x64x27xf32>
      %118 = vector.shape_cast %117 : vector<1x64x27xf32> to vector<64x27xf32>
      %119 = vector.shape_cast %116 : vector<64x27xf32> to vector<1x64x27xf32>
      tpu.vector_store %arg12[%c0_66, %c0_67, %c0_68], %119 {strides = array<i32>} : memref<1x64x27xf32, #tpu.memory_space<vmem>>, vector<1x64x27xf32>,
    } else {
    }
    %c0 = arith.constant 0 : index
    %c0_1 = arith.constant 0 : index
    %c0_2 = arith.constant 0 : index
    %3 = vector.load %arg12[%c0, %c0_1, %c0_2] : memref<1x64x27xf32, #tpu.memory_space<vmem>>, vector<1x64x27xf32>
    %4 = vector.shape_cast %3 : vector<1x64x27xf32> to vector<64x27xf32>
    %c0_3 = arith.constant 0 : index
    %c0_4 = arith.constant 0 : index
    %c0_5 = arith.constant 0 : index
    %5 = vector.load %arg3[%c0_3, %c0_4, %c0_5] : memref<1x1x27xf32, #tpu.memory_space<vmem>>, vector<1x1x27xf32>
    %6 = vector.shape_cast %5 : vector<1x1x27xf32> to vector<1x27xf32>
    %c0_6 = arith.constant 0 : index
    %c0_7 = arith.constant 0 : index
    %c0_8 = arith.constant 0 : index
    %7 = vector.load %arg4[%c0_6, %c0_7, %c0_8] : memref<1x1x27xf32, #tpu.memory_space<vmem>>, vector<1x1x27xf32>
    %8 = vector.shape_cast %7 : vector<1x1x27xf32> to vector<1x27xf32>
    %cst = arith.constant dense<0.000000e+00> : vector<64xf32>
    %9 = vector.multi_reduction <add>, %4, %cst [1] : vector<64x27xf32> to vector<64xf32>
    %10 = vector.shape_cast %9 : vector<64xf32> to vector<64x1xf32>
    %cst_9 = arith.constant 2.700000e+01 : f32
    %11 = vector.broadcast %cst_9 : f32 to vector<64x1xf32>
    %12 = arith.divf %10, %11 : vector<64x1xf32>
    %13 = vector.broadcast %12 : vector<64x1xf32> to vector<64x27xf32>
    %14 = arith.subf %4, %13 : vector<64x27xf32>
    %15 = arith.mulf %14, %14 : vector<64x27xf32>
    %cst_10 = arith.constant dense<0.000000e+00> : vector<64xf32>
    %16 = vector.multi_reduction <add>, %15, %cst_10 [1] : vector<64x27xf32> to vector<64xf32>
    %17 = vector.shape_cast %16 : vector<64xf32> to vector<64x1xf32>
    %cst_11 = arith.constant 2.700000e+01 : f32
    %18 = vector.broadcast %cst_11 : f32 to vector<64x1xf32>
    %19 = arith.divf %17, %18 : vector<64x1xf32>
    %cst_12 = arith.constant 9.99999974E-6 : f32
    %20 = vector.broadcast %cst_12 : f32 to vector<64x1xf32>
    %21 = arith.addf %19, %20 : vector<64x1xf32>
    %22 = math.rsqrt %21 : vector<64x1xf32>
    %23 = vector.broadcast %22 : vector<64x1xf32> to vector<64x27xf32>
    %24 = arith.mulf %14, %23 : vector<64x27xf32>
    %25 = vector.broadcast %6 : vector<1x27xf32> to vector<64x27xf32>
    %26 = arith.mulf %24, %25 : vector<64x27xf32>
    %27 = vector.broadcast %8 : vector<1x27xf32> to vector<64x27xf32>
    %28 = arith.addf %26, %27 : vector<64x27xf32>
    %29 = arith.truncf %28 : vector<64x27xf32> to vector<64x27xbf16>
    %c0_13 = arith.constant 0 : index
    %c0_14 = arith.constant 0 : index
    %c0_15 = arith.constant 0 : index
    %c0_16 = arith.constant 0 : index
    %30 = vector.load %arg5[%c0_13, %c0_14, %c0_15, %c0_16] : memref<1x3x27x27xbf16, #tpu.memory_space<vmem>>, vector<1x1x27x27xbf16>
    %31 = vector.shape_cast %30 : vector<1x1x27x27xbf16> to vector<27x27xbf16>
    %cst_17 = arith.constant dense<0.000000e+00> : vector<64x27xf32>
    %32 = tpu.matmul %29, %31, %cst_17 {dimension_numbers = #tpu.dot_dimension_numbers<[1], [0], [0], [1], [0, 0, 1, 1], [], []>} : vector<64x27xbf16>, vector<27x27xbf16>, vector<64x27xf32> -> vector<64x27xf32>
    %c0_18 = arith.constant 0 : index
    %c1 = arith.constant 1 : index
    %c0_19 = arith.constant 0 : index
    %c0_20 = arith.constant 0 : index
    %33 = vector.load %arg5[%c0_18, %c1, %c0_19, %c0_20] : memref<1x3x27x27xbf16, #tpu.memory_space<vmem>>, vector<1x1x27x27xbf16>
    %34 = vector.shape_cast %33 : vector<1x1x27x27xbf16> to vector<27x27xbf16>
    %cst_21 = arith.constant dense<0.000000e+00> : vector<64x27xf32>
    %35 = tpu.matmul %29, %34, %cst_21 {dimension_numbers = #tpu.dot_dimension_numbers<[1], [0], [0], [1], [0, 0, 1, 1], [], []>} : vector<64x27xbf16>, vector<27x27xbf16>, vector<64x27xf32> -> vector<64x27xf32>
    %c0_22 = arith.constant 0 : index
    %c2 = arith.constant 2 : index
    %c0_23 = arith.constant 0 : index
    %c0_24 = arith.constant 0 : index
    %36 = vector.load %arg5[%c0_22, %c2, %c0_23, %c0_24] : memref<1x3x27x27xbf16, #tpu.memory_space<vmem>>, vector<1x1x27x27xbf16>
    %37 = vector.shape_cast %36 : vector<1x1x27x27xbf16> to vector<27x27xbf16>
    %cst_25 = arith.constant dense<0.000000e+00> : vector<64x27xf32>
    %38 = tpu.matmul %29, %37, %cst_25 {dimension_numbers = #tpu.dot_dimension_numbers<[1], [0], [0], [1], [0, 0, 1, 1], [], []>} : vector<64x27xbf16>, vector<27x27xbf16>, vector<64x27xf32> -> vector<64x27xf32>
    %39 = arith.truncf %32 : vector<64x27xf32> to vector<64x27xbf16>
    %40 = arith.truncf %35 : vector<64x27xf32> to vector<64x27xbf16>
    %cst_26 = arith.constant dense<0.000000e+00> : vector<64x64xf32>
    %41 = tpu.matmul %39, %40, %cst_26 {dimension_numbers = #tpu.dot_dimension_numbers<[1], [1], [0], [0], [0, 0, 1, 0], [], []>} : vector<64x27xbf16>, vector<64x27xbf16>, vector<64x64xf32> -> vector<64x64xf32>
    %cst_27 = arith.constant 0.192450091 : f32
    %42 = vector.broadcast %cst_27 : f32 to vector<64x64xf32>
    %43 = arith.mulf %41, %42 : vector<64x64xf32>
    %cst_28 = arith.constant dense<0xFF800000> : vector<64xf32>
    %44 = vector.multi_reduction <maximumf>, %43, %cst_28 [1] : vector<64x64xf32> to vector<64xf32>
    %45 = vector.shape_cast %44 : vector<64xf32> to vector<64x1xf32>
    %46 = vector.broadcast %45 : vector<64x1xf32> to vector<64x64xf32>
    %47 = arith.subf %43, %46 : vector<64x64xf32>
    %48 = math.exp %47 : vector<64x64xf32>
    %cst_29 = arith.constant dense<0.000000e+00> : vector<64xf32>
    %49 = vector.multi_reduction <add>, %48, %cst_29 [1] : vector<64x64xf32> to vector<64xf32>
    %50 = vector.shape_cast %49 : vector<64xf32> to vector<64x1xf32>
    %51 = tpu.reciprocal %50 {approx = true} : vector<64x1xf32> -> vector<64x1xf32>
    %52 = vector.broadcast %51 : vector<64x1xf32> to vector<64x64xf32>
    %53 = arith.mulf %48, %52 : vector<64x64xf32>
    %54 = arith.truncf %53 : vector<64x64xf32> to vector<64x64xbf16>
    %55 = arith.truncf %38 : vector<64x27xf32> to vector<64x27xbf16>
    %cst_30 = arith.constant dense<0.000000e+00> : vector<64x27xf32>
    %56 = tpu.matmul %54, %55, %cst_30 {dimension_numbers = #tpu.dot_dimension_numbers<[1], [0], [0], [1], [0, 0, 1, 1], [], []>} : vector<64x64xbf16>, vector<64x27xbf16>, vector<64x27xf32> -> vector<64x27xf32>
    %57 = arith.addf %4, %56 : vector<64x27xf32>
    %c0_31 = arith.constant 0 : index
    %c0_32 = arith.constant 0 : index
    %c0_33 = arith.constant 0 : index
    %58 = vector.load %arg6[%c0_31, %c0_32, %c0_33] : memref<1x1x27xf32, #tpu.memory_space<vmem>>, vector<1x1x27xf32>
    %59 = vector.shape_cast %58 : vector<1x1x27xf32> to vector<1x27xf32>
    %c0_34 = arith.constant 0 : index
    %c0_35 = arith.constant 0 : index
    %c0_36 = arith.constant 0 : index
    %60 = vector.load %arg7[%c0_34, %c0_35, %c0_36] : memref<1x1x27xf32, #tpu.memory_space<vmem>>, vector<1x1x27xf32>
    %61 = vector.shape_cast %60 : vector<1x1x27xf32> to vector<1x27xf32>
    %cst_37 = arith.constant dense<0.000000e+00> : vector<64xf32>
    %62 = vector.multi_reduction <add>, %57, %cst_37 [1] : vector<64x27xf32> to vector<64xf32>
    %63 = vector.shape_cast %62 : vector<64xf32> to vector<64x1xf32>
    %cst_38 = arith.constant 2.700000e+01 : f32
    %64 = vector.broadcast %cst_38 : f32 to vector<64x1xf32>
    %65 = arith.divf %63, %64 : vector<64x1xf32>
    %66 = vector.broadcast %65 : vector<64x1xf32> to vector<64x27xf32>
    %67 = arith.subf %57, %66 : vector<64x27xf32>
    %68 = arith.mulf %67, %67 : vector<64x27xf32>
    %cst_39 = arith.constant dense<0.000000e+00> : vector<64xf32>
    %69 = vector.multi_reduction <add>, %68, %cst_39 [1] : vector<64x27xf32> to vector<64xf32>
    %70 = vector.shape_cast %69 : vector<64xf32> to vector<64x1xf32>
    %cst_40 = arith.constant 2.700000e+01 : f32
    %71 = vector.broadcast %cst_40 : f32 to vector<64x1xf32>
    %72 = arith.divf %70, %71 : vector<64x1xf32>
    %cst_41 = arith.constant 9.99999974E-6 : f32
    %73 = vector.broadcast %cst_41 : f32 to vector<64x1xf32>
    %74 = arith.addf %72, %73 : vector<64x1xf32>
    %75 = math.rsqrt %74 : vector<64x1xf32>
    %76 = vector.broadcast %75 : vector<64x1xf32> to vector<64x27xf32>
    %77 = arith.mulf %67, %76 : vector<64x27xf32>
    %78 = vector.broadcast %59 : vector<1x27xf32> to vector<64x27xf32>
    %79 = arith.mulf %77, %78 : vector<64x27xf32>
    %80 = vector.broadcast %61 : vector<1x27xf32> to vector<64x27xf32>
    %81 = arith.addf %79, %80 : vector<64x27xf32>
    %82 = arith.truncf %81 : vector<64x27xf32> to vector<64x27xbf16>
    %c0_42 = arith.constant 0 : index
    %c0_43 = arith.constant 0 : index
    %c0_44 = arith.constant 0 : index
    %83 = vector.load %arg8[%c0_42, %c0_43, %c0_44] : memref<1x27x27xbf16, #tpu.memory_space<vmem>>, vector<1x27x27xbf16>
    %84 = vector.shape_cast %83 : vector<1x27x27xbf16> to vector<27x27xbf16>
    %cst_45 = arith.constant dense<0.000000e+00> : vector<64x27xf32>
    %85 = tpu.matmul %82, %84, %cst_45 {dimension_numbers = #tpu.dot_dimension_numbers<[1], [0], [0], [1], [0, 0, 1, 1], [], []>} : vector<64x27xbf16>, vector<27x27xbf16>, vector<64x27xf32> -> vector<64x27xf32>
    %c0_46 = arith.constant 0 : index
    %c0_47 = arith.constant 0 : index
    %c0_48 = arith.constant 0 : index
    %86 = vector.load %arg9[%c0_46, %c0_47, %c0_48] : memref<1x1x27xf32, #tpu.memory_space<vmem>>, vector<1x1x27xf32>
    %87 = vector.shape_cast %86 : vector<1x1x27xf32> to vector<1x27xf32>
    %88 = vector.broadcast %87 : vector<1x27xf32> to vector<64x27xf32>
    %89 = arith.addf %85, %88 : vector<64x27xf32>
    %90 = arith.mulf %89, %89 : vector<64x27xf32>
    %91 = arith.mulf %89, %90 : vector<64x27xf32>
    %cst_49 = arith.constant 4.471500e-02 : f32
    %92 = vector.broadcast %cst_49 : f32 to vector<64x27xf32>
    %93 = arith.mulf %92, %91 : vector<64x27xf32>
    %94 = arith.addf %89, %93 : vector<64x27xf32>
    %cst_50 = arith.constant 0.797884583 : f32
    %95 = vector.broadcast %cst_50 : f32 to vector<64x27xf32>
    %96 = arith.mulf %95, %94 : vector<64x27xf32>
    %97 = math.tanh %96 : vector<64x27xf32>
    %cst_51 = arith.constant 1.000000e+00 : f32
    %98 = vector.broadcast %cst_51 : f32 to vector<64x27xf32>
    %99 = arith.addf %98, %97 : vector<64x27xf32>
    %cst_52 = arith.constant 5.000000e-01 : f32
    %100 = vector.broadcast %cst_52 : f32 to vector<64x27xf32>
    %101 = arith.mulf %100, %99 : vector<64x27xf32>
    %102 = arith.mulf %89, %101 : vector<64x27xf32>
    %103 = arith.truncf %102 : vector<64x27xf32> to vector<64x27xbf16>
    %c0_53 = arith.constant 0 : index
    %c0_54 = arith.constant 0 : index
    %c0_55 = arith.constant 0 : index
    %104 = vector.load %arg10[%c0_53, %c0_54, %c0_55] : memref<1x27x27xbf16, #tpu.memory_space<vmem>>, vector<1x27x27xbf16>
    %105 = vector.shape_cast %104 : vector<1x27x27xbf16> to vector<27x27xbf16>
    %cst_56 = arith.constant dense<0.000000e+00> : vector<64x27xf32>
    %106 = tpu.matmul %103, %105, %cst_56 {dimension_numbers = #tpu.dot_dimension_numbers<[1], [0], [0], [1], [0, 0, 1, 1], [], []>} : vector<64x27xbf16>, vector<27x27xbf16>, vector<64x27xf32> -> vector<64x27xf32>
    %c0_57 = arith.constant 0 : index
    %c0_58 = arith.constant 0 : index
    %c0_59 = arith.constant 0 : index
    %107 = vector.load %arg11[%c0_57, %c0_58, %c0_59] : memref<1x1x27xf32, #tpu.memory_space<vmem>>, vector<1x1x27xf32>
    %108 = vector.shape_cast %107 : vector<1x1x27xf32> to vector<1x27xf32>
    %109 = vector.broadcast %108 : vector<1x27xf32> to vector<64x27xf32>
    %110 = arith.addf %106, %109 : vector<64x27xf32>
    %111 = arith.addf %57, %110 : vector<64x27xf32>
    %c0_60 = arith.constant 0 : index
    %c0_61 = arith.constant 0 : index
    %c0_62 = arith.constant 0 : index
    %112 = vector.load %arg12[%c0_60, %c0_61, %c0_62] : memref<1x64x27xf32, #tpu.memory_space<vmem>>, vector<1x64x27xf32>
    %113 = vector.shape_cast %112 : vector<1x64x27xf32> to vector<64x27xf32>
    %114 = vector.shape_cast %111 : vector<64x27xf32> to vector<1x64x27xf32>
    tpu.vector_store %arg12[%c0_60, %c0_61, %c0_62], %114 {strides = array<i32>} : memref<1x64x27xf32, #tpu.memory_space<vmem>>, vector<1x64x27xf32>,
    return
  }
  func.func @transform_0(%arg0: i32, %arg1: i32) -> (i32, i32, i32) {
    %c0_i32 = arith.constant 0 : i32
    %c0_i32_0 = arith.constant 0 : i32
    %c0_i32_1 = arith.constant 0 : i32
    return %arg0, %c0_i32, %c0_i32_0 : i32, i32, i32
  }
  func.func @transform_1(%arg0: i32, %arg1: i32) -> (i32, i32, i32) {
    %c0_i32 = arith.constant 0 : i32
    %c0_i32_0 = arith.constant 0 : i32
    %c0_i32_1 = arith.constant 0 : i32
    return %arg1, %c0_i32, %c0_i32_0 : i32, i32, i32
  }
  func.func @transform_2(%arg0: i32, %arg1: i32) -> (i32, i32, i32) {
    %c0_i32 = arith.constant 0 : i32
    %c0_i32_0 = arith.constant 0 : i32
    %c0_i32_1 = arith.constant 0 : i32
    return %arg1, %c0_i32, %c0_i32_0 : i32, i32, i32
  }
  func.func @transform_3(%arg0: i32, %arg1: i32) -> (i32, i32, i32, i32) {
    %c0_i32 = arith.constant 0 : i32
    %c0_i32_0 = arith.constant 0 : i32
    %c0_i32_1 = arith.constant 0 : i32
    %c0_i32_2 = arith.constant 0 : i32
    return %arg1, %c0_i32, %c0_i32_0, %c0_i32_1 : i32, i32, i32, i32
  }
  func.func @transform_4(%arg0: i32, %arg1: i32) -> (i32, i32, i32) {
    %c0_i32 = arith.constant 0 : i32
    %c0_i32_0 = arith.constant 0 : i32
    %c0_i32_1 = arith.constant 0 : i32
    return %arg1, %c0_i32, %c0_i32_0 : i32, i32, i32
  }
  func.func @transform_5(%arg0: i32, %arg1: i32) -> (i32, i32, i32) {
    %c0_i32 = arith.constant 0 : i32
    %c0_i32_0 = arith.constant 0 : i32
    %c0_i32_1 = arith.constant 0 : i32
    return %arg1, %c0_i32, %c0_i32_0 : i32, i32, i32
  }
  func.func @transform_6(%arg0: i32, %arg1: i32) -> (i32, i32, i32) {
    %c0_i32 = arith.constant 0 : i32
    %c0_i32_0 = arith.constant 0 : i32
    %c0_i32_1 = arith.constant 0 : i32
    return %arg1, %c0_i32, %c0_i32_0 : i32, i32, i32
  }
  func.func @transform_7(%arg0: i32, %arg1: i32) -> (i32, i32, i32) {
    %c0_i32 = arith.constant 0 : i32
    %c0_i32_0 = arith.constant 0 : i32
    %c0_i32_1 = arith.constant 0 : i32
    return %arg1, %c0_i32, %c0_i32_0 : i32, i32, i32
  }
  func.func @transform_8(%arg0: i32, %arg1: i32) -> (i32, i32, i32) {
    %c0_i32 = arith.constant 0 : i32
    %c0_i32_0 = arith.constant 0 : i32
    %c0_i32_1 = arith.constant 0 : i32
    return %arg1, %c0_i32, %c0_i32_0 : i32, i32, i32
  }
  func.func @transform_9(%arg0: i32, %arg1: i32) -> (i32, i32, i32) {
    %c0_i32 = arith.constant 0 : i32
    %c0_i32_0 = arith.constant 0 : i32
    %c0_i32_1 = arith.constant 0 : i32
    return %arg1, %c0_i32, %c0_i32_0 : i32, i32, i32
  }
  func.func @transform_10(%arg0: i32, %arg1: i32) -> (i32, i32, i32) {
    %c0_i32 = arith.constant 0 : i32
    %c0_i32_0 = arith.constant 0 : i32
    %c0_i32_1 = arith.constant 0 : i32
    return %arg0, %c0_i32, %c0_i32_0 : i32, i32, i32
  }
}

module attributes {stable_mosaic.version = 11 : i64} {
  func.func @_linear_kernel(%arg0: i32, %arg1: memref<32x243xf32, #tpu.memory_space<vmem>>, %arg2: memref<243x32xbf16, #tpu.memory_space<vmem>>, %arg3: memref<1x32xf32, #tpu.memory_space<vmem>>, %arg4: memref<32x32xf32, #tpu.memory_space<vmem>>) attributes {dimension_semantics = [#tpu.dimension_semantics<parallel>], iteration_bounds = array<i64: 1>, scalar_prefetch = 0 : i64, scratch_operands = 0 : i64, tpu.core_type = #tpu.core_type<tc>, window_params = [{transform_indices = @transform_0, window_bounds = array<i64: 32, 243>}, {pipeline_mode = #tpu.pipeline_mode<synchronous>, transform_indices = @transform_1, window_bounds = array<i64: 243, 32>}, {pipeline_mode = #tpu.pipeline_mode<synchronous>, transform_indices = @transform_2, window_bounds = array<i64: 1, 32>}, {transform_indices = @transform_3, window_bounds = array<i64: 32, 32>}]} {
    %c0 = arith.constant 0 : index
    %c0_0 = arith.constant 0 : index
    %0 = vector.load %arg1[%c0, %c0_0] : memref<32x243xf32, #tpu.memory_space<vmem>>, vector<32x243xf32>
    %1 = arith.truncf %0 : vector<32x243xf32> to vector<32x243xbf16>
    %c0_1 = arith.constant 0 : index
    %c0_2 = arith.constant 0 : index
    %2 = vector.load %arg2[%c0_1, %c0_2] : memref<243x32xbf16, #tpu.memory_space<vmem>>, vector<243x32xbf16>
    %cst = arith.constant dense<0.000000e+00> : vector<32x32xf32>
    %3 = tpu.matmul %1, %2, %cst {dimension_numbers = #tpu.dot_dimension_numbers<[1], [0], [0], [1], [0, 0, 1, 1], [], []>} : vector<32x243xbf16>, vector<243x32xbf16>, vector<32x32xf32> -> vector<32x32xf32>
    %c0_3 = arith.constant 0 : index
    %c0_4 = arith.constant 0 : index
    %4 = vector.load %arg3[%c0_3, %c0_4] : memref<1x32xf32, #tpu.memory_space<vmem>>, vector<1x32xf32>
    %5 = vector.broadcast %4 : vector<1x32xf32> to vector<32x32xf32>
    %6 = arith.addf %3, %5 : vector<32x32xf32>
    %c0_5 = arith.constant 0 : index
    %c0_6 = arith.constant 0 : index
    %7 = vector.load %arg4[%c0_5, %c0_6] : memref<32x32xf32, #tpu.memory_space<vmem>>, vector<32x32xf32>
    tpu.vector_store %arg4[%c0_5, %c0_6], %6 {strides = array<i32>} : memref<32x32xf32, #tpu.memory_space<vmem>>, vector<32x32xf32>,
    return
  }
  func.func @transform_0(%arg0: i32) -> (i32, i32) {
    %c0_i32 = arith.constant 0 : i32
    %c0_i32_0 = arith.constant 0 : i32
    return %arg0, %c0_i32 : i32, i32
  }
  func.func @transform_1(%arg0: i32) -> (i32, i32) {
    %c0_i32 = arith.constant 0 : i32
    %c0_i32_0 = arith.constant 0 : i32
    %c0_i32_1 = arith.constant 0 : i32
    return %c0_i32, %c0_i32_0 : i32, i32
  }
  func.func @transform_2(%arg0: i32) -> (i32, i32) {
    %c0_i32 = arith.constant 0 : i32
    %c0_i32_0 = arith.constant 0 : i32
    %c0_i32_1 = arith.constant 0 : i32
    return %c0_i32, %c0_i32_0 : i32, i32
  }
  func.func @transform_3(%arg0: i32) -> (i32, i32) {
    %c0_i32 = arith.constant 0 : i32
    %c0_i32_0 = arith.constant 0 : i32
    return %arg0, %c0_i32 : i32, i32
  }
}

module attributes {stable_mosaic.version = 11 : i64} {
  func.func @kernel(%arg0: i32, %arg1: i32, %arg2: memref<1x17x32xf32, #tpu.memory_space<vmem>>, %arg3: memref<1x1x32xf32, #tpu.memory_space<vmem>>, %arg4: memref<1x1x32xf32, #tpu.memory_space<vmem>>, %arg5: memref<1x6x32x16xbf16, #tpu.memory_space<vmem>>, %arg6: memref<1x2x16x32xbf16, #tpu.memory_space<vmem>>, %arg7: memref<1x1x32xf32, #tpu.memory_space<vmem>>, %arg8: memref<1x1x32xf32, #tpu.memory_space<vmem>>, %arg9: memref<1x1x32xf32, #tpu.memory_space<vmem>>, %arg10: memref<1x32x64xbf16, #tpu.memory_space<vmem>>, %arg11: memref<1x1x64xf32, #tpu.memory_space<vmem>>, %arg12: memref<1x64x32xbf16, #tpu.memory_space<vmem>>, %arg13: memref<1x1x32xf32, #tpu.memory_space<vmem>>, %arg14: memref<1x17x32xf32, #tpu.memory_space<vmem>>) attributes {dimension_semantics = [#tpu.dimension_semantics<parallel>, #tpu.dimension_semantics<arbitrary>], iteration_bounds = array<i64: 2, 2>, scalar_prefetch = 0 : i64, scratch_operands = 0 : i64, tpu.core_type = #tpu.core_type<tc>, window_params = [{transform_indices = @transform_0, window_bounds = array<i64: 1, 17, 32>}, {transform_indices = @transform_1, window_bounds = array<i64: 1, 1, 32>}, {transform_indices = @transform_2, window_bounds = array<i64: 1, 1, 32>}, {transform_indices = @transform_3, window_bounds = array<i64: 1, 6, 32, 16>}, {transform_indices = @transform_4, window_bounds = array<i64: 1, 2, 16, 32>}, {transform_indices = @transform_5, window_bounds = array<i64: 1, 1, 32>}, {transform_indices = @transform_6, window_bounds = array<i64: 1, 1, 32>}, {transform_indices = @transform_7, window_bounds = array<i64: 1, 1, 32>}, {transform_indices = @transform_8, window_bounds = array<i64: 1, 32, 64>}, {transform_indices = @transform_9, window_bounds = array<i64: 1, 1, 64>}, {transform_indices = @transform_10, window_bounds = array<i64: 1, 64, 32>}, {transform_indices = @transform_11, window_bounds = array<i64: 1, 1, 32>}, {transform_indices = @transform_12, window_bounds = array<i64: 1, 17, 32>}]} {
    %c0_i32 = arith.constant 0 : i32
    %0 = arith.cmpi eq, %arg1, %c0_i32 : i32
    %1 = arith.extui %0 : i1 to i32
    %c0_i32_0 = arith.constant 0 : i32
    %2 = arith.cmpi ne, %1, %c0_i32_0 : i32
    scf.if %2 {
      %c0_93 = arith.constant 0 : index
      %c0_94 = arith.constant 0 : index
      %c0_95 = arith.constant 0 : index
      %155 = vector.load %arg2[%c0_93, %c0_94, %c0_95] : memref<1x17x32xf32, #tpu.memory_space<vmem>>, vector<1x17x32xf32>
      %156 = vector.shape_cast %155 : vector<1x17x32xf32> to vector<17x32xf32>
      %c0_96 = arith.constant 0 : index
      %c0_97 = arith.constant 0 : index
      %c0_98 = arith.constant 0 : index
      %157 = vector.load %arg14[%c0_96, %c0_97, %c0_98] : memref<1x17x32xf32, #tpu.memory_space<vmem>>, vector<1x17x32xf32>
      %158 = vector.shape_cast %157 : vector<1x17x32xf32> to vector<17x32xf32>
      %159 = vector.shape_cast %156 : vector<17x32xf32> to vector<1x17x32xf32>
      tpu.vector_store %arg14[%c0_96, %c0_97, %c0_98], %159 {strides = array<i32>} : memref<1x17x32xf32, #tpu.memory_space<vmem>>, vector<1x17x32xf32>,
    } else {
    }
    %c0 = arith.constant 0 : index
    %c0_1 = arith.constant 0 : index
    %c0_2 = arith.constant 0 : index
    %3 = vector.load %arg14[%c0, %c0_1, %c0_2] : memref<1x17x32xf32, #tpu.memory_space<vmem>>, vector<1x17x32xf32>
    %4 = vector.shape_cast %3 : vector<1x17x32xf32> to vector<17x32xf32>
    %c0_3 = arith.constant 0 : index
    %c0_4 = arith.constant 0 : index
    %c0_5 = arith.constant 0 : index
    %5 = vector.load %arg3[%c0_3, %c0_4, %c0_5] : memref<1x1x32xf32, #tpu.memory_space<vmem>>, vector<1x1x32xf32>
    %6 = vector.shape_cast %5 : vector<1x1x32xf32> to vector<1x32xf32>
    %c0_6 = arith.constant 0 : index
    %c0_7 = arith.constant 0 : index
    %c0_8 = arith.constant 0 : index
    %7 = vector.load %arg4[%c0_6, %c0_7, %c0_8] : memref<1x1x32xf32, #tpu.memory_space<vmem>>, vector<1x1x32xf32>
    %8 = vector.shape_cast %7 : vector<1x1x32xf32> to vector<1x32xf32>
    %cst = arith.constant dense<0.000000e+00> : vector<17xf32>
    %9 = vector.multi_reduction <add>, %4, %cst [1] : vector<17x32xf32> to vector<17xf32>
    %10 = vector.shape_cast %9 : vector<17xf32> to vector<17x1xf32>
    %cst_9 = arith.constant 3.200000e+01 : f32
    %11 = vector.broadcast %cst_9 : f32 to vector<17x1xf32>
    %12 = arith.divf %10, %11 : vector<17x1xf32>
    %13 = vector.broadcast %12 : vector<17x1xf32> to vector<17x32xf32>
    %14 = arith.subf %4, %13 : vector<17x32xf32>
    %15 = arith.mulf %14, %14 : vector<17x32xf32>
    %cst_10 = arith.constant dense<0.000000e+00> : vector<17xf32>
    %16 = vector.multi_reduction <add>, %15, %cst_10 [1] : vector<17x32xf32> to vector<17xf32>
    %17 = vector.shape_cast %16 : vector<17xf32> to vector<17x1xf32>
    %cst_11 = arith.constant 3.200000e+01 : f32
    %18 = vector.broadcast %cst_11 : f32 to vector<17x1xf32>
    %19 = arith.divf %17, %18 : vector<17x1xf32>
    %cst_12 = arith.constant 9.99999974E-6 : f32
    %20 = vector.broadcast %cst_12 : f32 to vector<17x1xf32>
    %21 = arith.addf %19, %20 : vector<17x1xf32>
    %22 = math.rsqrt %21 : vector<17x1xf32>
    %23 = vector.broadcast %22 : vector<17x1xf32> to vector<17x32xf32>
    %24 = arith.mulf %14, %23 : vector<17x32xf32>
    %25 = vector.broadcast %6 : vector<1x32xf32> to vector<17x32xf32>
    %26 = arith.mulf %24, %25 : vector<17x32xf32>
    %27 = vector.broadcast %8 : vector<1x32xf32> to vector<17x32xf32>
    %28 = arith.addf %26, %27 : vector<17x32xf32>
    %29 = arith.truncf %28 : vector<17x32xf32> to vector<17x32xbf16>
    %c0_13 = arith.constant 0 : index
    %c0_14 = arith.constant 0 : index
    %c0_15 = arith.constant 0 : index
    %30 = vector.load %arg7[%c0_13, %c0_14, %c0_15] : memref<1x1x32xf32, #tpu.memory_space<vmem>>, vector<1x1x32xf32>
    %31 = vector.shape_cast %30 : vector<1x1x32xf32> to vector<1x32xf32>
    %c0_16 = arith.constant 0 : index
    %c0_17 = arith.constant 0 : index
    %c0_18 = arith.constant 0 : index
    %c0_19 = arith.constant 0 : index
    %32 = vector.load %arg5[%c0_16, %c0_17, %c0_18, %c0_19] : memref<1x6x32x16xbf16, #tpu.memory_space<vmem>>, vector<1x1x32x16xbf16>
    %33 = vector.shape_cast %32 : vector<1x1x32x16xbf16> to vector<32x16xbf16>
    %cst_20 = arith.constant dense<0.000000e+00> : vector<17x16xf32>
    %34 = tpu.matmul %29, %33, %cst_20 {dimension_numbers = #tpu.dot_dimension_numbers<[1], [0], [0], [1], [0, 0, 1, 1], [], []>} : vector<17x32xbf16>, vector<32x16xbf16>, vector<17x16xf32> -> vector<17x16xf32>
    %c0_21 = arith.constant 0 : index
    %c2 = arith.constant 2 : index
    %c0_22 = arith.constant 0 : index
    %c0_23 = arith.constant 0 : index
    %35 = vector.load %arg5[%c0_21, %c2, %c0_22, %c0_23] : memref<1x6x32x16xbf16, #tpu.memory_space<vmem>>, vector<1x1x32x16xbf16>
    %36 = vector.shape_cast %35 : vector<1x1x32x16xbf16> to vector<32x16xbf16>
    %cst_24 = arith.constant dense<0.000000e+00> : vector<17x16xf32>
    %37 = tpu.matmul %29, %36, %cst_24 {dimension_numbers = #tpu.dot_dimension_numbers<[1], [0], [0], [1], [0, 0, 1, 1], [], []>} : vector<17x32xbf16>, vector<32x16xbf16>, vector<17x16xf32> -> vector<17x16xf32>
    %c0_25 = arith.constant 0 : index
    %c4 = arith.constant 4 : index
    %c0_26 = arith.constant 0 : index
    %c0_27 = arith.constant 0 : index
    %38 = vector.load %arg5[%c0_25, %c4, %c0_26, %c0_27] : memref<1x6x32x16xbf16, #tpu.memory_space<vmem>>, vector<1x1x32x16xbf16>
    %39 = vector.shape_cast %38 : vector<1x1x32x16xbf16> to vector<32x16xbf16>
    %cst_28 = arith.constant dense<0.000000e+00> : vector<17x16xf32>
    %40 = tpu.matmul %29, %39, %cst_28 {dimension_numbers = #tpu.dot_dimension_numbers<[1], [0], [0], [1], [0, 0, 1, 1], [], []>} : vector<17x32xbf16>, vector<32x16xbf16>, vector<17x16xf32> -> vector<17x16xf32>
    %41 = arith.truncf %34 : vector<17x16xf32> to vector<17x16xbf16>
    %42 = arith.truncf %37 : vector<17x16xf32> to vector<17x16xbf16>
    %cst_29 = arith.constant dense<0.000000e+00> : vector<17x17xf32>
    %43 = tpu.matmul %41, %42, %cst_29 {dimension_numbers = #tpu.dot_dimension_numbers<[1], [1], [0], [0], [0, 0, 1, 0], [], []>} : vector<17x16xbf16>, vector<17x16xbf16>, vector<17x17xf32> -> vector<17x17xf32>
    %cst_30 = arith.constant 2.500000e-01 : f32
    %44 = vector.broadcast %cst_30 : f32 to vector<17x17xf32>
    %45 = arith.mulf %43, %44 : vector<17x17xf32>
    %cst_31 = arith.constant dense<0xFF800000> : vector<17xf32>
    %46 = vector.multi_reduction <maximumf>, %45, %cst_31 [1] : vector<17x17xf32> to vector<17xf32>
    %47 = vector.shape_cast %46 : vector<17xf32> to vector<17x1xf32>
    %48 = vector.broadcast %47 : vector<17x1xf32> to vector<17x17xf32>
    %49 = arith.subf %45, %48 : vector<17x17xf32>
    %50 = math.exp %49 : vector<17x17xf32>
    %cst_32 = arith.constant dense<0.000000e+00> : vector<17xf32>
    %51 = vector.multi_reduction <add>, %50, %cst_32 [1] : vector<17x17xf32> to vector<17xf32>
    %52 = vector.shape_cast %51 : vector<17xf32> to vector<17x1xf32>
    %53 = tpu.reciprocal %52 {approx = true} : vector<17x1xf32> -> vector<17x1xf32>
    %54 = vector.broadcast %53 : vector<17x1xf32> to vector<17x17xf32>
    %55 = arith.mulf %50, %54 : vector<17x17xf32>
    %56 = arith.truncf %55 : vector<17x17xf32> to vector<17x17xbf16>
    %57 = arith.truncf %40 : vector<17x16xf32> to vector<17x16xbf16>
    %cst_33 = arith.constant dense<0.000000e+00> : vector<17x16xf32>
    %58 = tpu.matmul %56, %57, %cst_33 {dimension_numbers = #tpu.dot_dimension_numbers<[1], [0], [0], [1], [0, 0, 1, 1], [], []>} : vector<17x17xbf16>, vector<17x16xbf16>, vector<17x16xf32> -> vector<17x16xf32>
    %59 = arith.truncf %58 : vector<17x16xf32> to vector<17x16xbf16>
    %c0_34 = arith.constant 0 : index
    %c0_35 = arith.constant 0 : index
    %c0_36 = arith.constant 0 : index
    %c0_37 = arith.constant 0 : index
    %60 = vector.load %arg6[%c0_34, %c0_35, %c0_36, %c0_37] : memref<1x2x16x32xbf16, #tpu.memory_space<vmem>>, vector<1x1x16x32xbf16>
    %61 = vector.shape_cast %60 : vector<1x1x16x32xbf16> to vector<16x32xbf16>
    %cst_38 = arith.constant dense<0.000000e+00> : vector<17x32xf32>
    %62 = tpu.matmul %59, %61, %cst_38 {dimension_numbers = #tpu.dot_dimension_numbers<[1], [0], [0], [1], [0, 0, 1, 1], [], []>} : vector<17x16xbf16>, vector<16x32xbf16>, vector<17x32xf32> -> vector<17x32xf32>
    %63 = vector.broadcast %31 : vector<1x32xf32> to vector<17x32xf32>
    %64 = arith.addf %63, %62 : vector<17x32xf32>
    %c0_39 = arith.constant 0 : index
    %c1 = arith.constant 1 : index
    %c0_40 = arith.constant 0 : index
    %c0_41 = arith.constant 0 : index
    %65 = vector.load %arg5[%c0_39, %c1, %c0_40, %c0_41] : memref<1x6x32x16xbf16, #tpu.memory_space<vmem>>, vector<1x1x32x16xbf16>
    %66 = vector.shape_cast %65 : vector<1x1x32x16xbf16> to vector<32x16xbf16>
    %cst_42 = arith.constant dense<0.000000e+00> : vector<17x16xf32>
    %67 = tpu.matmul %29, %66, %cst_42 {dimension_numbers = #tpu.dot_dimension_numbers<[1], [0], [0], [1], [0, 0, 1, 1], [], []>} : vector<17x32xbf16>, vector<32x16xbf16>, vector<17x16xf32> -> vector<17x16xf32>
    %c0_43 = arith.constant 0 : index
    %c3 = arith.constant 3 : index
    %c0_44 = arith.constant 0 : index
    %c0_45 = arith.constant 0 : index
    %68 = vector.load %arg5[%c0_43, %c3, %c0_44, %c0_45] : memref<1x6x32x16xbf16, #tpu.memory_space<vmem>>, vector<1x1x32x16xbf16>
    %69 = vector.shape_cast %68 : vector<1x1x32x16xbf16> to vector<32x16xbf16>
    %cst_46 = arith.constant dense<0.000000e+00> : vector<17x16xf32>
    %70 = tpu.matmul %29, %69, %cst_46 {dimension_numbers = #tpu.dot_dimension_numbers<[1], [0], [0], [1], [0, 0, 1, 1], [], []>} : vector<17x32xbf16>, vector<32x16xbf16>, vector<17x16xf32> -> vector<17x16xf32>
    %c0_47 = arith.constant 0 : index
    %c5 = arith.constant 5 : index
    %c0_48 = arith.constant 0 : index
    %c0_49 = arith.constant 0 : index
    %71 = vector.load %arg5[%c0_47, %c5, %c0_48, %c0_49] : memref<1x6x32x16xbf16, #tpu.memory_space<vmem>>, vector<1x1x32x16xbf16>
    %72 = vector.shape_cast %71 : vector<1x1x32x16xbf16> to vector<32x16xbf16>
    %cst_50 = arith.constant dense<0.000000e+00> : vector<17x16xf32>
    %73 = tpu.matmul %29, %72, %cst_50 {dimension_numbers = #tpu.dot_dimension_numbers<[1], [0], [0], [1], [0, 0, 1, 1], [], []>} : vector<17x32xbf16>, vector<32x16xbf16>, vector<17x16xf32> -> vector<17x16xf32>
    %74 = arith.truncf %67 : vector<17x16xf32> to vector<17x16xbf16>
    %75 = arith.truncf %70 : vector<17x16xf32> to vector<17x16xbf16>
    %cst_51 = arith.constant dense<0.000000e+00> : vector<17x17xf32>
    %76 = tpu.matmul %74, %75, %cst_51 {dimension_numbers = #tpu.dot_dimension_numbers<[1], [1], [0], [0], [0, 0, 1, 0], [], []>} : vector<17x16xbf16>, vector<17x16xbf16>, vector<17x17xf32> -> vector<17x17xf32>
    %cst_52 = arith.constant 2.500000e-01 : f32
    %77 = vector.broadcast %cst_52 : f32 to vector<17x17xf32>
    %78 = arith.mulf %76, %77 : vector<17x17xf32>
    %cst_53 = arith.constant dense<0xFF800000> : vector<17xf32>
    %79 = vector.multi_reduction <maximumf>, %78, %cst_53 [1] : vector<17x17xf32> to vector<17xf32>
    %80 = vector.shape_cast %79 : vector<17xf32> to vector<17x1xf32>
    %81 = vector.broadcast %80 : vector<17x1xf32> to vector<17x17xf32>
    %82 = arith.subf %78, %81 : vector<17x17xf32>
    %83 = math.exp %82 : vector<17x17xf32>
    %cst_54 = arith.constant dense<0.000000e+00> : vector<17xf32>
    %84 = vector.multi_reduction <add>, %83, %cst_54 [1] : vector<17x17xf32> to vector<17xf32>
    %85 = vector.shape_cast %84 : vector<17xf32> to vector<17x1xf32>
    %86 = tpu.reciprocal %85 {approx = true} : vector<17x1xf32> -> vector<17x1xf32>
    %87 = vector.broadcast %86 : vector<17x1xf32> to vector<17x17xf32>
    %88 = arith.mulf %83, %87 : vector<17x17xf32>
    %89 = arith.truncf %88 : vector<17x17xf32> to vector<17x17xbf16>
    %90 = arith.truncf %73 : vector<17x16xf32> to vector<17x16xbf16>
    %cst_55 = arith.constant dense<0.000000e+00> : vector<17x16xf32>
    %91 = tpu.matmul %89, %90, %cst_55 {dimension_numbers = #tpu.dot_dimension_numbers<[1], [0], [0], [1], [0, 0, 1, 1], [], []>} : vector<17x17xbf16>, vector<17x16xbf16>, vector<17x16xf32> -> vector<17x16xf32>
    %92 = arith.truncf %91 : vector<17x16xf32> to vector<17x16xbf16>
    %c0_56 = arith.constant 0 : index
    %c1_57 = arith.constant 1 : index
    %c0_58 = arith.constant 0 : index
    %c0_59 = arith.constant 0 : index
    %93 = vector.load %arg6[%c0_56, %c1_57, %c0_58, %c0_59] : memref<1x2x16x32xbf16, #tpu.memory_space<vmem>>, vector<1x1x16x32xbf16>
    %94 = vector.shape_cast %93 : vector<1x1x16x32xbf16> to vector<16x32xbf16>
    %cst_60 = arith.constant dense<0.000000e+00> : vector<17x32xf32>
    %95 = tpu.matmul %92, %94, %cst_60 {dimension_numbers = #tpu.dot_dimension_numbers<[1], [0], [0], [1], [0, 0, 1, 1], [], []>} : vector<17x16xbf16>, vector<16x32xbf16>, vector<17x32xf32> -> vector<17x32xf32>
    %96 = arith.addf %64, %95 : vector<17x32xf32>
    %97 = arith.addf %4, %96 : vector<17x32xf32>
    %c0_61 = arith.constant 0 : index
    %c0_62 = arith.constant 0 : index
    %c0_63 = arith.constant 0 : index
    %98 = vector.load %arg8[%c0_61, %c0_62, %c0_63] : memref<1x1x32xf32, #tpu.memory_space<vmem>>, vector<1x1x32xf32>
    %99 = vector.shape_cast %98 : vector<1x1x32xf32> to vector<1x32xf32>
    %c0_64 = arith.constant 0 : index
    %c0_65 = arith.constant 0 : index
    %c0_66 = arith.constant 0 : index
    %100 = vector.load %arg9[%c0_64, %c0_65, %c0_66] : memref<1x1x32xf32, #tpu.memory_space<vmem>>, vector<1x1x32xf32>
    %101 = vector.shape_cast %100 : vector<1x1x32xf32> to vector<1x32xf32>
    %cst_67 = arith.constant dense<0.000000e+00> : vector<17xf32>
    %102 = vector.multi_reduction <add>, %97, %cst_67 [1] : vector<17x32xf32> to vector<17xf32>
    %103 = vector.shape_cast %102 : vector<17xf32> to vector<17x1xf32>
    %cst_68 = arith.constant 3.200000e+01 : f32
    %104 = vector.broadcast %cst_68 : f32 to vector<17x1xf32>
    %105 = arith.divf %103, %104 : vector<17x1xf32>
    %106 = vector.broadcast %105 : vector<17x1xf32> to vector<17x32xf32>
    %107 = arith.subf %97, %106 : vector<17x32xf32>
    %108 = arith.mulf %107, %107 : vector<17x32xf32>
    %cst_69 = arith.constant dense<0.000000e+00> : vector<17xf32>
    %109 = vector.multi_reduction <add>, %108, %cst_69 [1] : vector<17x32xf32> to vector<17xf32>
    %110 = vector.shape_cast %109 : vector<17xf32> to vector<17x1xf32>
    %cst_70 = arith.constant 3.200000e+01 : f32
    %111 = vector.broadcast %cst_70 : f32 to vector<17x1xf32>
    %112 = arith.divf %110, %111 : vector<17x1xf32>
    %cst_71 = arith.constant 9.99999974E-6 : f32
    %113 = vector.broadcast %cst_71 : f32 to vector<17x1xf32>
    %114 = arith.addf %112, %113 : vector<17x1xf32>
    %115 = math.rsqrt %114 : vector<17x1xf32>
    %116 = vector.broadcast %115 : vector<17x1xf32> to vector<17x32xf32>
    %117 = arith.mulf %107, %116 : vector<17x32xf32>
    %118 = vector.broadcast %99 : vector<1x32xf32> to vector<17x32xf32>
    %119 = arith.mulf %117, %118 : vector<17x32xf32>
    %120 = vector.broadcast %101 : vector<1x32xf32> to vector<17x32xf32>
    %121 = arith.addf %119, %120 : vector<17x32xf32>
    %122 = arith.truncf %121 : vector<17x32xf32> to vector<17x32xbf16>
    %c0_72 = arith.constant 0 : index
    %c0_73 = arith.constant 0 : index
    %c0_74 = arith.constant 0 : index
    %123 = vector.load %arg10[%c0_72, %c0_73, %c0_74] : memref<1x32x64xbf16, #tpu.memory_space<vmem>>, vector<1x32x64xbf16>
    %124 = vector.shape_cast %123 : vector<1x32x64xbf16> to vector<32x64xbf16>
    %cst_75 = arith.constant dense<0.000000e+00> : vector<17x64xf32>
    %125 = tpu.matmul %122, %124, %cst_75 {dimension_numbers = #tpu.dot_dimension_numbers<[1], [0], [0], [1], [0, 0, 1, 1], [], []>} : vector<17x32xbf16>, vector<32x64xbf16>, vector<17x64xf32> -> vector<17x64xf32>
    %c0_76 = arith.constant 0 : index
    %c0_77 = arith.constant 0 : index
    %c0_78 = arith.constant 0 : index
    %126 = vector.load %arg11[%c0_76, %c0_77, %c0_78] : memref<1x1x64xf32, #tpu.memory_space<vmem>>, vector<1x1x64xf32>
    %127 = vector.shape_cast %126 : vector<1x1x64xf32> to vector<1x64xf32>
    %128 = vector.broadcast %127 : vector<1x64xf32> to vector<17x64xf32>
    %129 = arith.addf %125, %128 : vector<17x64xf32>
    %130 = arith.mulf %129, %129 : vector<17x64xf32>
    %131 = arith.mulf %129, %130 : vector<17x64xf32>
    %cst_79 = arith.constant 4.471500e-02 : f32
    %132 = vector.broadcast %cst_79 : f32 to vector<17x64xf32>
    %133 = arith.mulf %132, %131 : vector<17x64xf32>
    %134 = arith.addf %129, %133 : vector<17x64xf32>
    %cst_80 = arith.constant 0.797884583 : f32
    %135 = vector.broadcast %cst_80 : f32 to vector<17x64xf32>
    %136 = arith.mulf %135, %134 : vector<17x64xf32>
    %137 = math.tanh %136 : vector<17x64xf32>
    %cst_81 = arith.constant 1.000000e+00 : f32
    %138 = vector.broadcast %cst_81 : f32 to vector<17x64xf32>
    %139 = arith.addf %138, %137 : vector<17x64xf32>
    %cst_82 = arith.constant 5.000000e-01 : f32
    %140 = vector.broadcast %cst_82 : f32 to vector<17x64xf32>
    %141 = arith.mulf %140, %139 : vector<17x64xf32>
    %142 = arith.mulf %129, %141 : vector<17x64xf32>
    %143 = arith.truncf %142 : vector<17x64xf32> to vector<17x64xbf16>
    %c0_83 = arith.constant 0 : index
    %c0_84 = arith.constant 0 : index
    %c0_85 = arith.constant 0 : index
    %144 = vector.load %arg12[%c0_83, %c0_84, %c0_85] : memref<1x64x32xbf16, #tpu.memory_space<vmem>>, vector<1x64x32xbf16>
    %145 = vector.shape_cast %144 : vector<1x64x32xbf16> to vector<64x32xbf16>
    %cst_86 = arith.constant dense<0.000000e+00> : vector<17x32xf32>
    %146 = tpu.matmul %143, %145, %cst_86 {dimension_numbers = #tpu.dot_dimension_numbers<[1], [0], [0], [1], [0, 0, 1, 1], [], []>} : vector<17x64xbf16>, vector<64x32xbf16>, vector<17x32xf32> -> vector<17x32xf32>
    %c0_87 = arith.constant 0 : index
    %c0_88 = arith.constant 0 : index
    %c0_89 = arith.constant 0 : index
    %147 = vector.load %arg13[%c0_87, %c0_88, %c0_89] : memref<1x1x32xf32, #tpu.memory_space<vmem>>, vector<1x1x32xf32>
    %148 = vector.shape_cast %147 : vector<1x1x32xf32> to vector<1x32xf32>
    %149 = vector.broadcast %148 : vector<1x32xf32> to vector<17x32xf32>
    %150 = arith.addf %146, %149 : vector<17x32xf32>
    %151 = arith.addf %97, %150 : vector<17x32xf32>
    %c0_90 = arith.constant 0 : index
    %c0_91 = arith.constant 0 : index
    %c0_92 = arith.constant 0 : index
    %152 = vector.load %arg14[%c0_90, %c0_91, %c0_92] : memref<1x17x32xf32, #tpu.memory_space<vmem>>, vector<1x17x32xf32>
    %153 = vector.shape_cast %152 : vector<1x17x32xf32> to vector<17x32xf32>
    %154 = vector.shape_cast %151 : vector<17x32xf32> to vector<1x17x32xf32>
    tpu.vector_store %arg14[%c0_90, %c0_91, %c0_92], %154 {strides = array<i32>} : memref<1x17x32xf32, #tpu.memory_space<vmem>>, vector<1x17x32xf32>,
    return
  }
  func.func @transform_0(%arg0: i32, %arg1: i32) -> (i32, i32, i32) {
    %c0_i32 = arith.constant 0 : i32
    %c0_i32_0 = arith.constant 0 : i32
    %c0_i32_1 = arith.constant 0 : i32
    return %arg0, %c0_i32, %c0_i32_0 : i32, i32, i32
  }
  func.func @transform_1(%arg0: i32, %arg1: i32) -> (i32, i32, i32) {
    %c0_i32 = arith.constant 0 : i32
    %c0_i32_0 = arith.constant 0 : i32
    %c0_i32_1 = arith.constant 0 : i32
    return %arg1, %c0_i32, %c0_i32_0 : i32, i32, i32
  }
  func.func @transform_2(%arg0: i32, %arg1: i32) -> (i32, i32, i32) {
    %c0_i32 = arith.constant 0 : i32
    %c0_i32_0 = arith.constant 0 : i32
    %c0_i32_1 = arith.constant 0 : i32
    return %arg1, %c0_i32, %c0_i32_0 : i32, i32, i32
  }
  func.func @transform_3(%arg0: i32, %arg1: i32) -> (i32, i32, i32, i32) {
    %c0_i32 = arith.constant 0 : i32
    %c0_i32_0 = arith.constant 0 : i32
    %c0_i32_1 = arith.constant 0 : i32
    %c0_i32_2 = arith.constant 0 : i32
    return %arg1, %c0_i32, %c0_i32_0, %c0_i32_1 : i32, i32, i32, i32
  }
  func.func @transform_4(%arg0: i32, %arg1: i32) -> (i32, i32, i32, i32) {
    %c0_i32 = arith.constant 0 : i32
    %c0_i32_0 = arith.constant 0 : i32
    %c0_i32_1 = arith.constant 0 : i32
    %c0_i32_2 = arith.constant 0 : i32
    return %arg1, %c0_i32, %c0_i32_0, %c0_i32_1 : i32, i32, i32, i32
  }
  func.func @transform_5(%arg0: i32, %arg1: i32) -> (i32, i32, i32) {
    %c0_i32 = arith.constant 0 : i32
    %c0_i32_0 = arith.constant 0 : i32
    %c0_i32_1 = arith.constant 0 : i32
    return %arg1, %c0_i32, %c0_i32_0 : i32, i32, i32
  }
  func.func @transform_6(%arg0: i32, %arg1: i32) -> (i32, i32, i32) {
    %c0_i32 = arith.constant 0 : i32
    %c0_i32_0 = arith.constant 0 : i32
    %c0_i32_1 = arith.constant 0 : i32
    return %arg1, %c0_i32, %c0_i32_0 : i32, i32, i32
  }
  func.func @transform_7(%arg0: i32, %arg1: i32) -> (i32, i32, i32) {
    %c0_i32 = arith.constant 0 : i32
    %c0_i32_0 = arith.constant 0 : i32
    %c0_i32_1 = arith.constant 0 : i32
    return %arg1, %c0_i32, %c0_i32_0 : i32, i32, i32
  }
  func.func @transform_8(%arg0: i32, %arg1: i32) -> (i32, i32, i32) {
    %c0_i32 = arith.constant 0 : i32
    %c0_i32_0 = arith.constant 0 : i32
    %c0_i32_1 = arith.constant 0 : i32
    return %arg1, %c0_i32, %c0_i32_0 : i32, i32, i32
  }
  func.func @transform_9(%arg0: i32, %arg1: i32) -> (i32, i32, i32) {
    %c0_i32 = arith.constant 0 : i32
    %c0_i32_0 = arith.constant 0 : i32
    %c0_i32_1 = arith.constant 0 : i32
    return %arg1, %c0_i32, %c0_i32_0 : i32, i32, i32
  }
  func.func @transform_10(%arg0: i32, %arg1: i32) -> (i32, i32, i32) {
    %c0_i32 = arith.constant 0 : i32
    %c0_i32_0 = arith.constant 0 : i32
    %c0_i32_1 = arith.constant 0 : i32
    return %arg1, %c0_i32, %c0_i32_0 : i32, i32, i32
  }
  func.func @transform_11(%arg0: i32, %arg1: i32) -> (i32, i32, i32) {
    %c0_i32 = arith.constant 0 : i32
    %c0_i32_0 = arith.constant 0 : i32
    %c0_i32_1 = arith.constant 0 : i32
    return %arg1, %c0_i32, %c0_i32_0 : i32, i32, i32
  }
  func.func @transform_12(%arg0: i32, %arg1: i32) -> (i32, i32, i32) {
    %c0_i32 = arith.constant 0 : i32
    %c0_i32_0 = arith.constant 0 : i32
    %c0_i32_1 = arith.constant 0 : i32
    return %arg0, %c0_i32, %c0_i32_0 : i32, i32, i32
  }
}

</mosaic_0001>

<bundles_post_ra>
// kernel: t2t_vit_forward.3
= control target key start
LH: loop header
LB: loop body
LE: loop exit
PB: predicated region body
PF: predicated region fallthrough
CT: control target
= control target key end

     0   :  { %s2266_s13 = smov 0   ;;  %s2268_s14 = smov 0   ;;  %s2700_s0 = inlined_call_operand.vmem [shape: f32[2,64,27], index: 0, kind: input, shape index: {}]   ;;  %s2701_s1 = inlined_call_operand.vmem [shape: f32[1,1,27], index: 1, kind: input, shape index: {}]   ;;  %s2702_s2 = inlined_call_operand.vmem [shape: f32[1,1,27], index: 2, kind: input, shape index: {}]   ;;  %s2703_s3 = inlined_call_operand.vmem [shape: bf16[1,3,27,27], index: 3, kind: input, shape index: {}]   ;;  %s2704_s4 = inlined_call_operand.vmem [shape: f32[1,1,27], index: 4, kind: input, shape index: {}]   ;;  %s2705_s5 = inlined_call_operand.vmem [shape: f32[1,1,27], index: 5, kind: input, shape index: {}]   ;;  %s2706_s6 = inlined_call_operand.vmem [shape: bf16[1,27,27], index: 6, kind: input, shape index: {}]   ;;  %s2707_s7 = inlined_call_operand.vmem [shape: f32[1,1,27], index: 7, kind: input, shape index: {}]   ;;  %s2708_s8 = inlined_call_operand.vmem [shape: bf16[1,27,27], index: 8, kind: input, shape index: {}]   ;;  %s2709_s9 = inlined_call_operand.vmem [shape: f32[1,1,27], index: 9, kind: input, shape index: {}]   ;;  %s2710_s10 = inlined_call_operand.vmem [shape: f32[2,64,27], index: 10, kind: output, shape index: {}]  }
   0x1   :  { %s2270_s15 = smov 0  }
   0x2 LB: > { %s32_s16 = sadd.s32 1, %s2204_s14  ;;  %p1868_p0 = scmp.ge.s32.totalorder %s2208_s15, 1  ;;  %s2208_s15 = sphi %s2270_s15, %s20_s15   ;;  %s2204_s14 = sphi %s2268_s14, %s2712_s14   ;;  %s2200_s13 = sphi %s2266_s13, %s2711_s13  }
   0x3   : > { %p34_p1 = scmp.ge.s32.totalorder %s32_s16, 2  ;;  %p402_p2 = scmp.lt.s32.totalorder %s2208_s15, 3 }
   0x5   : > { %s2714_s16 = smov (%p34_p1, %s32_s16), 0  ;;  %p403_p3 = pnand %p1868_p0, %p402_p2 }
   0x6   : > { %p473_p4 = scmp.lt.s32.totalorder (!%p403_p3), %s2200_s13, 1  ;;  %vm529_vm0 = vcmask (!%p403_p3), 220160   ;;  %vm713_vm1 = vcmask (!%p403_p3), 1044480   ;;  %vm714_vm2 = vcmask (!%p403_p3), 1045504   ;;  %vm1058_vm3 = vcmask (!%p403_p3), 523264  }
   0x7   : > { %406 = sbr.rel (%p403_p3) target bundleno = 2146 (0x862), region = 60 }
   0xe   : > { %s2716_s13 = smov (!%p473_p4, %s2200_s13), 1 }
   0xf   : > { %s1927_s17 = sshll.u32 %s2716_s13, 6 }
  0x10   : > { %s477_s20 = scalar_lea.vmem %s2700_s0, %s1927_s17  ;;  %s2290_s23 = scalar_lea.vmem %s2710_s10, %s1927_s17 }
  0x11   : > { %v521_v0 = vld [vmem:[%s477_s20] sm:$0xff]  ;;  %v523_v1 = vld [vmem:[%s477_s20 + $0x10] sm:$0xff]  ;;  %v522_v2 = vld [vmem:[%s477_s20 + $0x8] sm:$0xff] }
  0x12   : > { %530 = vst.msk [vmem:[%s2290_s23] sm:$0xff] %vm529_vm0, %v521_v0  ;;  %532 = vst.msk [vmem:[%s2290_s23 + $0x10] sm:$0xff] %vm529_vm0, %v523_v1  ;;  %v524_v3 = vld [vmem:[%s477_s20 + $0x18] sm:$0xff]  ;;  %v525_v4 = vld [vmem:[%s477_s20 + $0x20] sm:$0xff] }
  0x13   : > { %531 = vst.msk [vmem:[%s2290_s23 + $0x8] sm:$0xff] %vm529_vm0, %v522_v2  ;;  %v526_v5 = vld [vmem:[%s477_s20 + $0x28] sm:$0xff]  ;;  %533 = vst.msk [vmem:[%s2290_s23 + $0x18] sm:$0xff] %vm529_vm0, %v524_v3  ;;  %v527_v6 = vld [vmem:[%s477_s20 + $0x30] sm:$0xff]  ;;  %v2210_v3 = vmov 65535  }
  0x14   : > { %534 = vst.msk [vmem:[%s2290_s23 + $0x20] sm:$0xff] %vm529_vm0, %v525_v4  ;;  %535 = vst.msk [vmem:[%s2290_s23 + $0x28] sm:$0xff] %vm529_vm0, %v526_v5  ;;  %v528_v7 = vld [vmem:[%s477_s20 + $0x38] sm:$0xff]  ;;  %v2096_v0 = vld [vmem:[%s2703_s3] sm:$0xff]   ;;  %v715_v4 = vsel %vm713_vm1, 4294967295, %v2210_v3 }
  0x15   : > { %536 = vst.msk [vmem:[%s2290_s23 + $0x30] sm:$0xff] %vm529_vm0, %v527_v6  ;;  %537 = vst.msk [vmem:[%s2290_s23 + $0x38] sm:$0xff] %vm529_vm0, %v528_v7  ;;  %v2097_v1 = vld [vmem:[%s2703_s3 + $0x10] sm:$0xff]   ;;  %1975 = vmatprep.subr.bf16.mxu0 %v2096_v0  ;;  %v2098_v2 = vld [vmem:[%s2703_s3 + $0x8] sm:$0x3f]   ;;  %v2408_v6 = vsel %vm714_vm2, %v715_v4, 0 }
  0x16   : > { %1987 = vmatprep.subr.bf16.mxu1 %v2097_v1  ;;  %v2099_v5 = vld [vmem:[%s2703_s3 + $0x18] sm:$0x3f]   ;;  %1976 = vmatpush3.bf16.msra.mxu0 %v2096_v0  ;;  %v718_v7 = vand.u32 %v2098_v2, %v2408_v6 }
  0x17   : > { %1988 = vmatpush3.bf16.msra.mxu1 %v2097_v1 }
  0x18   : > { %1977 = vmatprep.subr.bf16.mxu0 %v718_v7 }
  0x19   : > { %v2309_v8 = vld [vmem:[%s2290_s23] sm:$0xff]  ;;  %v2312_v9 = vld [vmem:[%s2290_s23 + $0x10] sm:$0xff] }
  0x1a   : > { %v2315_v10 = vld [vmem:[%s2290_s23 + $0x8] sm:$0xff]  ;;  %v549_v11 = vsel %vm529_vm0, %v2309_v8, 0.0  ;;  %v555_v12 = vsel %vm529_vm0, %v2312_v9, 0.0  ;;  %v2322_v13 = vld [vmem:[%s2290_s23 + $0x18] sm:$0xff]  ;;  %1978 = vmatpush3.bf16.msra.mxu0 %v718_v7 }
  0x1b   : > { %550 = vadd.xlane.f32.xlu0 %v549_v11  ;;  %556 = vadd.xlane.f32.xlu1 %v555_v12  ;;  %v552_v14 = vsel %vm529_vm0, %v2315_v10, 0.0  ;;  %v558_v15 = vsel %vm529_vm0, %v2322_v13, 0.0  ;;  %v2329_v16 = vld [vmem:[%s2290_s23 + $0x20] sm:$0xff]  ;;  %v2332_v17 = vld [vmem:[%s2290_s23 + $0x28] sm:$0xff]  ;;  %v802_v11 = vand.u32 %v2099_v5, %v2408_v6 }
  0x1c   : > { %v561_v18 = vsel %vm529_vm0, %v2329_v16, 0.0  ;;  %v564_v19 = vsel %vm529_vm0, %v2332_v17, 0.0  ;;  %v2339_v20 = vld [vmem:[%s2290_s23 + $0x30] sm:$0xff]  ;;  %v2342_v21 = vld [vmem:[%s2290_s23 + $0x38] sm:$0xff]  ;;  %v2415_v12 = vld [vmem:[%s2703_s3 + $0x20] sm:$0xff]  }
  0x1d   : > { %v567_v22 = vsel %vm529_vm0, %v2339_v20, 0.0  ;;  %v570_v23 = vsel %vm529_vm0, %v2342_v21, 0.0  ;;  %1989 = vmatprep.subr.bf16.mxu1 %v802_v11  ;;  %1999 = vmatprep.subr.bf16.mxu0 %v2415_v12 }
  0x1e   : > { %1990 = vmatpush3.bf16.msra.mxu1 %v802_v11 }
  0x1f   : > { %553 = vadd.xlane.f32.xlu0 %v552_v14  ;;  %559 = vadd.xlane.f32.xlu1 %v558_v15 }
  0x23   : > { %562 = vadd.xlane.f32.xlu0 %v561_v18  ;;  %565 = vadd.xlane.f32.xlu1 %v564_v19 }
  0x27   : > { %568 = vadd.xlane.f32.xlu0 %v567_v22  ;;  %571 = vadd.xlane.f32.xlu1 %v570_v23 }
  0xa8   : > { %v551_v24 = vpop.xlane.xlu0 %550  ;;  %v557_v25 = vpop.xlane.xlu1 %556 }
  0xa9   : > { %v574_v26 = vmul.f32 0.037037037, %v551_v24  ;;  %v576_v27 = vmul.f32 0.037037037, %v557_v25 }
  0xab   : > { %v2349_v28 = vsub.f32 %v2309_v8, %v574_v26  ;;  %v2352_v29 = vsub.f32 %v2312_v9, %v576_v27 }
  0xac   : > { %v554_v30 = vpop.xlane.xlu0 %553  ;;  %v560_v31 = vpop.xlane.xlu1 %559 }
  0xad   : > { %v575_v32 = vmul.f32 0.037037037, %v554_v30  ;;  %v577_v33 = vmul.f32 0.037037037, %v560_v31  ;;  %v590_v34 = vmul.f32 %v2349_v28, %v2349_v28  ;;  %v592_v35 = vmul.f32 %v2352_v29, %v2352_v29 }
  0xaf   : > { %v2359_v36 = vsub.f32 %v2315_v10, %v575_v32  ;;  %v2362_v37 = vsub.f32 %v2322_v13, %v577_v33  ;;  %v598_v38 = vsel %vm529_vm0, %v590_v34, 0.0  ;;  %v604_v41 = vsel %vm529_vm0, %v592_v35, 0.0 }
  0xb0   : > { %599 = vadd.xlane.f32.xlu0 %v598_v38  ;;  %v563_v39 = vpop.xlane.xlu0 %562  ;;  %v566_v40 = vpop.xlane.xlu1 %565 }
  0xb1   : > { %v578_v42 = vmul.f32 0.037037037, %v563_v39  ;;  %v579_v43 = vmul.f32 0.037037037, %v566_v40  ;;  %v591_v44 = vmul.f32 %v2359_v36, %v2359_v36  ;;  %v593_v45 = vmul.f32 %v2362_v37, %v2362_v37 }
  0xb3   : > { %v2371_v46 = vsub.f32 %v2329_v16, %v578_v42  ;;  %v2374_v47 = vsub.f32 %v2332_v17, %v579_v43  ;;  %v601_v48 = vsel %vm529_vm0, %v591_v44, 0.0  ;;  %v607_v51 = vsel %vm529_vm0, %v593_v45, 0.0 }
  0xb4   : > { %605 = vadd.xlane.f32.xlu0 %v604_v41  ;;  %602 = vadd.xlane.f32.xlu1 %v601_v48  ;;  %v569_v49 = vpop.xlane.xlu0 %568  ;;  %v572_v50 = vpop.xlane.xlu1 %571 }
  0xb5   : > { %v580_v52 = vmul.f32 0.037037037, %v569_v49  ;;  %v581_v53 = vmul.f32 0.037037037, %v572_v50  ;;  %v594_v54 = vmul.f32 %v2371_v46, %v2371_v46  ;;  %v595_v55 = vmul.f32 %v2374_v47, %v2374_v47  ;;  %v1873_v49 = vld [vmem:[%s2701_s1] ss:$0 sm:$0xff] }
  0xb7   : > { %v2383_v56 = vsub.f32 %v2339_v20, %v580_v52  ;;  %v2386_v57 = vsub.f32 %v2342_v21, %v581_v53  ;;  %v610_v58 = vsel %vm529_vm0, %v594_v54, 0.0  ;;  %v613_v59 = vsel %vm529_vm0, %v595_v55, 0.0 }
  0xb8   : > { %608 = vadd.xlane.f32.xlu1 %v607_v51  ;;  %611 = vadd.xlane.f32.xlu0 %v610_v58 }
  0xb9   : > { %v596_v60 = vmul.f32 %v2383_v56, %v2383_v56  ;;  %v597_v61 = vmul.f32 %v2386_v57, %v2386_v57 }
  0xbb   : > { %v616_v62 = vsel %vm529_vm0, %v596_v60, 0.0  ;;  %v619_v63 = vsel %vm529_vm0, %v597_v61, 0.0 }
  0xbc   : > { %614 = vadd.xlane.f32.xlu1 %v613_v59  ;;  %617 = vadd.xlane.f32.xlu0 %v616_v62 }
  0xc0   : > { %620 = vadd.xlane.f32.xlu1 %v619_v63 }
 0x13d   : > { %v600_v14 = vpop.xlane.xlu0 %599 }
 0x13e   : > { %v622_v15 = vmul.f32 0.037037037, %v600_v14 }
 0x140   : > { %v630_v18 = vadd.f32 1e-05, %v622_v15 }
 0x141   : > { %v603_v19 = vpop.xlane.xlu1 %602  ;;  %v606_v22 = vpop.xlane.xlu0 %605 }
 0x142   : > { %2106 = vrsqrt.f32 %v630_v18  ;;  %v623_v23 = vmul.f32 0.037037037, %v603_v19  ;;  %v624_v24 = vmul.f32 0.037037037, %v606_v22 }
 0x144   : > { %v631_v25 = vadd.f32 1e-05, %v623_v23  ;;  %v632_v26 = vadd.f32 1e-05, %v624_v24 }
 0x145   : > { %v609_v27 = vpop.xlane.xlu1 %608  ;;  %v612_v30 = vpop.xlane.xlu0 %611 }
 0x146   : > { %2108 = vrsqrt.f32 %v631_v25  ;;  %v625_v31 = vmul.f32 0.037037037, %v609_v27  ;;  %v626_v32 = vmul.f32 0.037037037, %v612_v30 }
 0x147   : > { %2110 = vrsqrt.f32 %v632_v26 }
 0x148   : > { %v633_v33 = vadd.f32 1e-05, %v625_v31  ;;  %v634_v34 = vadd.f32 1e-05, %v626_v32 }
 0x149   : > { %v615_v35 = vpop.xlane.xlu1 %614  ;;  %v618_v38 = vpop.xlane.xlu0 %617 }
 0x14a   : > { %2112 = vrsqrt.f32 %v633_v33  ;;  %v627_v39 = vmul.f32 0.037037037, %v615_v35  ;;  %v628_v40 = vmul.f32 0.037037037, %v618_v38 }
 0x14b   : > { %2114 = vrsqrt.f32 %v634_v34 }
 0x14c   : > { %v2107_v41 = vpop.eup %2106  ;;  %v635_v42 = vadd.f32 1e-05, %v627_v39  ;;  %v636_v43 = vadd.f32 1e-05, %v628_v40 }
 0x14d   : > { %v621_v44 = vpop.xlane.xlu1 %620  ;;  %v646_v45 = vmul.f32 %v2107_v41, %v2349_v28  ;;  %v1874_v28 = vld [vmem:[%s2702_s2] ss:$0 sm:$0xff] }
 0x14e   : > { %2116 = vrsqrt.f32 %v635_v42  ;;  %v629_v48 = vmul.f32 0.037037037, %v621_v44 }
 0x14f   : > { %2118 = vrsqrt.f32 %v636_v43  ;;  %v660_v54 = vmul.f32 %v1873_v49, %v646_v45 }
 0x150   : > { %v2109_v50 = vpop.eup %2108  ;;  %v637_v51 = vadd.f32 1e-05, %v629_v48 }
 0x151   : > { %v2111_v52 = vpop.eup %2110  ;;  %v647_v53 = vmul.f32 %v2109_v50, %v2359_v36  ;;  %v674_v62 = vadd.f32 %v1874_v28, %v660_v54 }
 0x152   : > { %v648_v55 = vmul.f32 %v2111_v52, %v2352_v29  ;;  %2120 = vrsqrt.f32 %v637_v51  ;;  %v2101_v29 = vld [vmem:[%s2703_s3 + $0x28] sm:$0x3f]  }
 0x153   : > { %v661_v58 = vmul.f32 %v1873_v49, %v647_v53  ;;  %v886_v18 = vand.u32 %v2101_v29, %v2408_v6 }
 0x154   : > { %v2113_v59 = vpop.eup %2112  ;;  %v662_v0 = vmul.f32 %v1873_v49, %v648_v55 }
 0x155   : > { %v2115_v60 = vpop.eup %2114  ;;  %v649_v61 = vmul.f32 %v2113_v59, %v2362_v37  ;;  %v675_v63 = vadd.f32 %v1874_v28, %v661_v58 }
 0x156   : > { %v650_v1 = vmul.f32 %v2115_v60, %v2371_v46  ;;  %v676_v37 = vadd.f32 %v1874_v28, %v662_v0 }
 0x157   : > { %v682_v2 = vpack.c.bf16 %v675_v63, %v674_v62  ;;  %v663_v36 = vmul.f32 %v1873_v49, %v649_v61 }
 0x158   : > { %v2117_v3 = vpop.eup %2116  ;;  %v664_v4 = vmul.f32 %v1873_v49, %v650_v1 }
 0x159   : > { %v2119_v5 = vpop.eup %2118  ;;  %v651_v7 = vmul.f32 %v2117_v3, %v2374_v47  ;;  %1979 = vmatprep.mubr.msk.bf16.mxu0 %vm529_vm0, %v682_v2  ;;  %1991 = vmatprep.mubr.msk.bf16.mxu1 %vm529_vm0, %v682_v2  ;;  %v677_v11 = vadd.f32 %v1874_v28, %v663_v36 }
 0x15a   : > { %v652_v14 = vmul.f32 %v2119_v5, %v2383_v56  ;;  %v678_v22 = vadd.f32 %v1874_v28, %v664_v4 }
 0x15b   : > { %v683_v46 = vpack.c.bf16 %v677_v11, %v676_v37  ;;  %v665_v15 = vmul.f32 %v1873_v49, %v651_v7 }
 0x15c   : > { %v2121_v19 = vpop.eup %2120  ;;  %v666_v24 = vmul.f32 %v1873_v49, %v652_v14 }
 0x15d   : > { %v653_v23 = vmul.f32 %v2121_v19, %v2386_v57  ;;  %1980 = vmatmul.mubr.msk.bf16.vlgmr.msra.gmra.mrb[0].mxu0 %vm529_vm0, %v683_v46  ;;  %1992 = vmatmul.mubr.msk.bf16.vlgmr.msra.gmra.mrb[0].mxu1 %vm529_vm0, %v683_v46  ;;  %v679_v47 = vadd.f32 %v1874_v28, %v665_v15 }
 0x15e   : > { %2000 = vmatpush3.bf16.msra.mxu0 %v2415_v12  ;;  %v680_v56 = vadd.f32 %v1874_v28, %v666_v24 }
 0x15f   : > { %v684_v25 = vpack.c.bf16 %v679_v47, %v678_v22  ;;  %v667_v26 = vmul.f32 %v1873_v49, %v653_v23  ;;  %2001 = vmatprep.subr.bf16.mxu0 %v886_v18 }
 0x161   : > { %1983 = vmatprep.mubr.msk.bf16.mxu0 %vm529_vm0, %v684_v25  ;;  %1995 = vmatprep.mubr.msk.bf16.mxu1 %vm529_vm0, %v684_v25  ;;  %v681_v27 = vadd.f32 %v1874_v28, %v667_v26 }
 0x162   : > { %2002 = vmatpush3.bf16.msra.mxu0 %v886_v18 }
 0x163   : > { %v685_v30 = vpack.c.bf16 %v681_v27, %v680_v56 }
 0x165   : > { %1984 = vmatmul.mubr.msk.bf16.gmra.mrb[4].mxu0 %vm529_vm0, %v685_v30  ;;  %1996 = vmatmul.mubr.msk.bf16.gmra.mrb[4].mxu1 %vm529_vm0, %v685_v30 }
 0x166   : > { %2003 = vmatprep.mubr.msk.bf16.mxu0 %vm529_vm0, %v682_v2 }
 0x16d   : > { %2004 = vmatmul.mubr.msk.bf16.vlgmr.msra.gmra.mrb[8].mxu0 %vm529_vm0, %v683_v46 }
 0x16e   : > { %2007 = vmatprep.mubr.msk.bf16.mxu0 %vm529_vm0, %v684_v25 }
 0x175   : > { %2008 = vmatmul.mubr.msk.bf16.gmra.mrb[12].mxu0 %vm529_vm0, %v685_v30 }
 0x230   : > { %v1981_v57 = vpop.f32.mrb[0].mxu0  ;;  %v1993_v12 = vpop.f32.mrb[0].mxu1 }
 0x231   : > { %v754_v31 = vpop.f32.mrb[1].mxu0  ;;  %v838_v32 = vpop.f32.mrb[1].mxu1 }
 0x232   : > { %v1982_v33 = vpop.f32.mrb[2].mxu0  ;;  %v1994_v34 = vpop.f32.mrb[2].mxu1 }
 0x233   : > { %v954_v35 = vpack.c.bf16 %v1982_v33, %v1981_v57  ;;  %v958_v38 = vpack.c.bf16 %v1994_v34, %v1993_v12  ;;  %v757_v39 = vpop.f32.mrb[3].mxu0  ;;  %v841_v40 = vpop.f32.mrb[3].mxu1 }
 0x234   : > { %v953_v41 = vpack.c.bf16 %v757_v39, %v754_v31  ;;  %v957_v42 = vpack.c.bf16 %v841_v40, %v838_v32 }
 0x235   : > { %v977_v59 = vsel %vm529_vm0, %v958_v38, 0 }
 0x236   : > { %v974_v43 = vsel %vm529_vm0, %v957_v42, 0  ;;  %2067 = vmatprep.subr.msk.bf16.mxu1 %vm529_vm0, %v957_v42  ;;  %2019 = vmatprep.mubr.msk.bf16.mxu1 %vm529_vm0, %v953_v41 }
 0x237   : > { %2012 = vmatpush3.bf16.xpose.msra.mxu1 %v974_v43 }
 0x238   : > { %v1985_v44 = vpop.f32.mrb[4].mxu0  ;;  %v1997_v45 = vpop.f32.mrb[4].mxu1  ;;  %2068 = vmatprep.subr.msk.bf16.mxu1 %vm529_vm0, %v958_v38 }
 0x239   : > { %v770_v48 = vpop.f32.mrb[5].mxu0  ;;  %v854_v49 = vpop.f32.mrb[5].mxu1 }
 0x23a   : > { %v1986_v50 = vpop.f32.mrb[6].mxu0  ;;  %v1998_v51 = vpop.f32.mrb[6].mxu1 }
 0x23b   : > { %v956_v52 = vpack.c.bf16 %v1986_v50, %v1985_v44  ;;  %v960_v53 = vpack.c.bf16 %v1998_v51, %v1997_v45  ;;  %v773_v54 = vpop.f32.mrb[7].mxu0  ;;  %v857_v55 = vpop.f32.mrb[7].mxu1 }
 0x23c   : > { %v955_v28 = vpack.c.bf16 %v773_v54, %v770_v48  ;;  %v959_v58 = vpack.c.bf16 %v857_v55, %v854_v49 }
 0x23d   : > { %v983_v37 = vsel %vm529_vm0, %v960_v53, 0 }
 0x23e   : > { %v980_v2 = vsel %vm529_vm0, %v959_v58, 0 }
 0x23f   : > { %2014 = vmatpush3.bf16.xpose.msra.mxu1 %v977_v59 }
 0x240   : > { %v2005_v60 = vpop.f32.mrb[8].mxu0  ;;  %2069 = vmatprep.subr.msk.bf16.mxu1 %vm529_vm0, %v959_v58 }
 0x241   : > { %v922_v61 = vpop.f32.mrb[9].mxu0 }
 0x242   : > { %v2006_v62 = vpop.f32.mrb[10].mxu0 }
 0x243   : > { %v1152_v63 = vpack.c.bf16 %v2006_v62, %v2005_v60  ;;  %v925_v0 = vpop.f32.mrb[11].mxu0 }
 0x244   : > { %v1151_v1 = vpack.c.bf16 %v925_v0, %v922_v61 }
 0x246   : > { %2027 = vmatprep.subr.bf16.mxu0 %v1151_v1 }
 0x247   : > { %2016 = vmatpush3.bf16.xpose.msra.mxu1 %v980_v2  ;;  %2028 = vmatpush3.bf16.msra.mxu0 %v1151_v1 }
 0x248   : > { %v2009_v36 = vpop.f32.mrb[12].mxu0  ;;  %2070 = vmatprep.subr.msk.bf16.mxu1 %vm529_vm0, %v960_v53  ;;  %2029 = vmatprep.subr.bf16.mxu0 %v1152_v63 }
 0x249   : > { %v938_v29 = vpop.f32.mrb[13].mxu0 }
 0x24a   : > { %v2010_v3 = vpop.f32.mrb[14].mxu0 }
 0x24b   : > { %v1154_v4 = vpack.c.bf16 %v2010_v3, %v2009_v36  ;;  %v941_v5 = vpop.f32.mrb[15].mxu0  ;;  %2030 = vmatpush3.bf16.msra.mxu0 %v1152_v63 }
 0x24c   : > { %v1153_v7 = vpack.c.bf16 %v941_v5, %v938_v29 }
 0x24e   : > { %2031 = vmatprep.subr.bf16.mxu0 %v1153_v7 }
 0x24f   : > { %2018 = vmatpush3.bf16.xpose.msra.mxu1 %v983_v37  ;;  %2032 = vmatpush3.bf16.msra.mxu0 %v1153_v7 }
 0x250   : > { %2033 = vmatprep.subr.bf16.mxu0 %v1154_v4 }
 0x253   : > { %2034 = vmatpush3.bf16.msra.mxu0 %v1154_v4 }
 0x256   : > { %2020 = vmatmul.mubr.msk.bf16.vlgmr.msra.gmra.mrb[8].mxu1 %vm529_vm0, %v954_v35 }
 0x257   : > { %2023 = vmatprep.mubr.msk.bf16.mxu1 %vm529_vm0, %v955_v28 }
 0x25e   : > { %2024 = vmatmul.mubr.msk.bf16.gmra.mrb[12].mxu1 %vm529_vm0, %v956_v52 }
 0x329   : > { %v2021_v11 = vpop.f32.mrb[8].mxu1 }
 0x32a   : > { %v1019_v14 = vpop.f32.mrb[9].mxu1  ;;  %v1052_v19 = vmul.f32 0.19245009, %v2021_v11 }
 0x32b   : > { %v1050_v46 = vmul.f32 0.19245009, %v1019_v14  ;;  %v2022_v15 = vpop.f32.mrb[10].mxu1 }
 0x32c   : > { %v1022_v18 = vpop.f32.mrb[11].mxu1  ;;  %v1053_v47 = vmul.f32 0.19245009, %v2022_v15  ;;  %v1065_v26 = vsel %vm1058_vm3, %v1052_v19, -inf }
 0x32d   : > { %v1051_v22 = vmul.f32 0.19245009, %v1022_v18  ;;  %v1059_v23 = vsel %vm1058_vm3, %v1050_v46, -inf }
 0x32e   : > { %1060 = vmax.xlane.f32.xlu0 %v1059_v23  ;;  %v1068_v57 = vsel %vm1058_vm3, %v1053_v47, -inf }
 0x32f   : > { %v1062_v24 = vsel %vm1058_vm3, %v1051_v22, -inf }
 0x330   : > { %1063 = vmax.xlane.f32.xlu1 %v1062_v24 }
 0x331   : > { %v2025_v25 = vpop.f32.mrb[12].mxu1 }
 0x332   : > { %1066 = vmax.xlane.f32.xlu0 %v1065_v26  ;;  %v1035_v56 = vpop.f32.mrb[13].mxu1  ;;  %v1056_v31 = vmul.f32 0.19245009, %v2025_v25 }
 0x333   : > { %v1054_v27 = vmul.f32 0.19245009, %v1035_v56  ;;  %v2026_v30 = vpop.f32.mrb[14].mxu1 }
 0x334   : > { %1069 = vmax.xlane.f32.xlu1 %v1068_v57  ;;  %v1038_v12 = vpop.f32.mrb[15].mxu1  ;;  %v1057_v34 = vmul.f32 0.19245009, %v2026_v30  ;;  %v1077_v38 = vsel %vm1058_vm3, %v1056_v31, -inf }
 0x335   : > { %v1055_v32 = vmul.f32 0.19245009, %v1038_v12  ;;  %v1071_v33 = vsel %vm1058_vm3, %v1054_v27, -inf }
 0x336   : > { %1072 = vmax.xlane.f32.xlu0 %v1071_v33  ;;  %v1080_v39 = vsel %vm1058_vm3, %v1057_v34, -inf }
 0x337   : > { %v1074_v35 = vsel %vm1058_vm3, %v1055_v32, -inf }
 0x338   : > { %1075 = vmax.xlane.f32.xlu1 %v1074_v35 }
 0x33a   : > { %1078 = vmax.xlane.f32.xlu0 %v1077_v38 }
 0x33c   : > { %1081 = vmax.xlane.f32.xlu1 %v1080_v39 }
 0x3bb   : > { %v1061_v40 = vpop.xlane.xlu0 %1060 }
 0x3bc   : > { %v1083_v41 = vsub.f32 %v1050_v46, %v1061_v40 }
 0x3bd   : > { %v1064_v42 = vpop.xlane.xlu1 %1063 }
 0x3be   : > { %v1091_v43 = vmul.f32 1.442695, %v1083_v41  ;;  %v1084_v44 = vsub.f32 %v1051_v22, %v1064_v42 }
 0x3bf   : > { %v1067_v45 = vpop.xlane.xlu0 %1066 }
 0x3c0   : > { %2122 = vpow2.f32 %v1091_v43  ;;  %v1093_v48 = vmul.f32 1.442695, %v1084_v44  ;;  %v1085_v49 = vsub.f32 %v1052_v19, %v1067_v45 }
 0x3c1   : > { %v1070_v50 = vpop.xlane.xlu1 %1069 }
 0x3c2   : > { %2124 = vpow2.f32 %v1093_v48  ;;  %v1095_v51 = vmul.f32 1.442695, %v1085_v49  ;;  %v1086_v52 = vsub.f32 %v1053_v47, %v1070_v50 }
 0x3c3   : > { %v1073_v53 = vpop.xlane.xlu0 %1072 }
 0x3c4   : > { %2126 = vpow2.f32 %v1095_v51  ;;  %v1097_v54 = vmul.f32 1.442695, %v1086_v52  ;;  %v1087_v55 = vsub.f32 %v1054_v27, %v1073_v53 }
 0x3c5   : > { %v1076_v28 = vpop.xlane.xlu1 %1075 }
 0x3c6   : > { %2128 = vpow2.f32 %v1097_v54  ;;  %v1099_v58 = vmul.f32 1.442695, %v1087_v55  ;;  %v1088_v59 = vsub.f32 %v1055_v32, %v1076_v28 }
 0x3c7   : > { %v1079_v60 = vpop.xlane.xlu0 %1078 }
 0x3c8   : > { %2130 = vpow2.f32 %v1099_v58  ;;  %v1101_v61 = vmul.f32 1.442695, %v1088_v59  ;;  %v1089_v62 = vsub.f32 %v1056_v31, %v1079_v60 }
 0x3c9   : > { %v1082_v63 = vpop.xlane.xlu1 %1081 }
 0x3ca   : > { %v2123_v0 = vpop.eup %2122  ;;  %2132 = vpow2.f32 %v1101_v61  ;;  %v1103_v1 = vmul.f32 1.442695, %v1089_v62  ;;  %v1090_v2 = vsub.f32 %v1057_v34, %v1082_v63 }
 0x3cb   : > { %v1107_v36 = vsel %vm1058_vm3, %v2123_v0, 0.0 }
 0x3cc   : > { %v2125_v29 = vpop.eup %2124  ;;  %2134 = vpow2.f32 %v1103_v1  ;;  %v1105_v3 = vmul.f32 1.442695, %v1090_v2  ;;  %1108 = vadd.xlane.f32.xlu0 %v1107_v36 }
 0x3cd   : > { %v1110_v4 = vsel %vm1058_vm3, %v2125_v29, 0.0 }
 0x3ce   : > { %v2127_v5 = vpop.eup %2126  ;;  %2136 = vpow2.f32 %v1105_v3  ;;  %1111 = vadd.xlane.f32.xlu1 %v1110_v4 }
 0x3cf   : > { %v1113_v7 = vsel %vm1058_vm3, %v2127_v5, 0.0 }
 0x3d0   : > { %v2129_v37 = vpop.eup %2128  ;;  %1114 = vadd.xlane.f32.xlu0 %v1113_v7 }
 0x3d1   : > { %v1116_v11 = vsel %vm1058_vm3, %v2129_v37, 0.0 }
 0x3d2   : > { %v2131_v14 = vpop.eup %2130  ;;  %1117 = vadd.xlane.f32.xlu1 %v1116_v11 }
 0x3d3   : > { %v1119_v46 = vsel %vm1058_vm3, %v2131_v14, 0.0 }
 0x3d4   : > { %v2133_v15 = vpop.eup %2132  ;;  %1120 = vadd.xlane.f32.xlu0 %v1119_v46 }
 0x3d5   : > { %v1122_v18 = vsel %vm1058_vm3, %v2133_v15, 0.0 }
 0x3d6   : > { %v2135_v19 = vpop.eup %2134  ;;  %1123 = vadd.xlane.f32.xlu1 %v1122_v18 }
 0x3d7   : > { %v1125_v22 = vsel %vm1058_vm3, %v2135_v19, 0.0 }
 0x3d8   : > { %v2137_v23 = vpop.eup %2136  ;;  %1126 = vadd.xlane.f32.xlu0 %v1125_v22 }
 0x3d9   : > { %v1128_v47 = vsel %vm1058_vm3, %v2137_v23, 0.0 }
 0x3da   : > { %1129 = vadd.xlane.f32.xlu1 %v1128_v47 }
 0x459   : > { %v1109_v24 = vpop.xlane.xlu0 %1108 }
 0x45a   : > { %2138 = vrcp.f32 %v1109_v24 }
 0x45b   : > { %v1112_v25 = vpop.xlane.xlu1 %1111 }
 0x45c   : > { %2140 = vrcp.f32 %v1112_v25 }
 0x45d   : > { %v1115_v26 = vpop.xlane.xlu0 %1114 }
 0x45e   : > { %2142 = vrcp.f32 %v1115_v26 }
 0x45f   : > { %v1118_v56 = vpop.xlane.xlu1 %1117 }
 0x460   : > { %2144 = vrcp.f32 %v1118_v56 }
 0x461   : > { %v1121_v27 = vpop.xlane.xlu0 %1120 }
 0x462   : > { %2146 = vrcp.f32 %v1121_v27 }
 0x463   : > { %v1124_v30 = vpop.xlane.xlu1 %1123 }
 0x464   : > { %v2139_v57 = vpop.eup %2138  ;;  %2148 = vrcp.f32 %v1124_v30 }
 0x465   : > { %v1127_v12 = vpop.xlane.xlu0 %1126  ;;  %v1139_v33 = vmul.f32 %v2139_v57, %v2123_v0 }
 0x466   : > { %v2141_v31 = vpop.eup %2140  ;;  %2150 = vrcp.f32 %v1127_v12 }
 0x467   : > { %v1130_v32 = vpop.xlane.xlu1 %1129  ;;  %v1140_v34 = vmul.f32 %v2141_v31, %v2125_v29 }
 0x468   : > { %v2143_v35 = vpop.eup %2142  ;;  %2152 = vrcp.f32 %v1130_v32 }
 0x469   : > { %v1147_v38 = vpack.c.bf16 %v1140_v34, %v1139_v33  ;;  %v1141_v40 = vmul.f32 %v2143_v35, %v2127_v5 }
 0x46a   : > { %v2145_v39 = vpop.eup %2144 }
 0x46b   : > { %v1142_v41 = vmul.f32 %v2145_v39, %v2129_v37  ;;  %2035 = vmatprep.mubr.msk.bf16.mxu0 %vm1058_vm3, %v1147_v38 }
 0x46c   : > { %v2147_v42 = vpop.eup %2146 }
 0x46d   : > { %v1148_v43 = vpack.c.bf16 %v1142_v41, %v1141_v40  ;;  %v1143_v45 = vmul.f32 %v2147_v42, %v2131_v14 }
 0x46e   : > { %v2149_v44 = vpop.eup %2148 }
 0x46f   : > { %2036 = vmatmul.mubr.msk.bf16.vlgmr.msra.gmra.mrb[16].mxu0 %vm1058_vm3, %v1148_v43  ;;  %v1144_v48 = vmul.f32 %v2149_v44, %v2133_v15 }
 0x470   : > { %v2151_v49 = vpop.eup %2150 }
 0x471   : > { %v1149_v50 = vpack.c.bf16 %v1144_v48, %v1143_v45  ;;  %v1145_v52 = vmul.f32 %v2151_v49, %v2135_v19 }
 0x472   : > { %v2153_v51 = vpop.eup %2152 }
 0x473   : > { %2039 = vmatprep.mubr.msk.bf16.mxu0 %vm1058_vm3, %v1149_v50  ;;  %v1146_v53 = vmul.f32 %v2153_v51, %v2137_v23 }
 0x475   : > { %v1150_v54 = vpack.c.bf16 %v1146_v53, %v1145_v52 }
 0x477   : > { %2040 = vmatmul.mubr.msk.bf16.gmra.mrb[20].mxu0 %vm1058_vm3, %v1150_v54 }
 0x542   : > { %v2037_v55 = vpop.f32.mrb[16].mxu0 }
 0x543   : > { %v1201_v28 = vpop.f32.mrb[17].mxu0  ;;  %v2485_v61 = vadd.f32 %v2037_v55, %v2312_v9 }
 0x544   : > { %v2482_v58 = vadd.f32 %v1201_v28, %v2309_v8  ;;  %v2038_v59 = vpop.f32.mrb[18].mxu0  ;;  %v2102_v28 = vld [vmem:[%s2706_s6] sm:$0xff]  }
 0x545   : > { %v1204_v60 = vpop.f32.mrb[19].mxu0  ;;  %v2493_v0 = vadd.f32 %v2038_v59, %v2322_v13  ;;  %v1248_v2 = vsel %vm529_vm0, %v2485_v61, 0.0  ;;  %2043 = vmatprep.subr.bf16.mxu0 %v2102_v28  ;;  %v2103_v59 = vld [vmem:[%s2706_s6 + $0x8] sm:$0x3f]  }
 0x546   : > { %v2488_v62 = vadd.f32 %v1204_v60, %v2315_v10  ;;  %v1242_v63 = vsel %vm529_vm0, %v2482_v58, 0.0  ;;  %2044 = vmatpush3.bf16.msra.mxu0 %v2102_v28  ;;  %v1413_v60 = vand.u32 %v2103_v59, %v2408_v6 }
 0x547   : > { %1243 = vadd.xlane.f32.xlu0 %v1242_v63  ;;  %v1251_v29 = vsel %vm529_vm0, %v2493_v0, 0.0 }
 0x548   : > { %v1245_v1 = vsel %vm529_vm0, %v2488_v62, 0.0  ;;  %2045 = vmatprep.subr.bf16.mxu0 %v1413_v60 }
 0x549   : > { %1246 = vadd.xlane.f32.xlu1 %v1245_v1 }
 0x54a   : > { %v2041_v8 = vpop.f32.mrb[20].mxu0  ;;  %2046 = vmatpush3.bf16.msra.mxu0 %v1413_v60 }
 0x54b   : > { %1249 = vadd.xlane.f32.xlu0 %v1248_v2  ;;  %v1217_v9 = vpop.f32.mrb[21].mxu0  ;;  %v2505_v3 = vadd.f32 %v2041_v8, %v2339_v20 }
 0x54c   : > { %v2500_v10 = vadd.f32 %v1217_v9, %v2329_v16  ;;  %v2042_v36 = vpop.f32.mrb[22].mxu0 }
 0x54d   : > { %1252 = vadd.xlane.f32.xlu1 %v1251_v29  ;;  %v1220_v13 = vpop.f32.mrb[23].mxu0  ;;  %v2513_v7 = vadd.f32 %v2042_v36, %v2342_v21  ;;  %v1260_v37 = vsel %vm529_vm0, %v2505_v3, 0.0 }
 0x54e   : > { %v2508_v4 = vadd.f32 %v1220_v13, %v2332_v17  ;;  %v1254_v5 = vsel %vm529_vm0, %v2500_v10, 0.0 }
 0x54f   : > { %1255 = vadd.xlane.f32.xlu0 %v1254_v5  ;;  %v1263_v20 = vsel %vm529_vm0, %v2513_v7, 0.0 }
 0x550   : > { %v1257_v16 = vsel %vm529_vm0, %v2508_v4, 0.0 }
 0x551   : > { %1258 = vadd.xlane.f32.xlu1 %v1257_v16 }
 0x553   : > { %1261 = vadd.xlane.f32.xlu0 %v1260_v37 }
 0x555   : > { %1264 = vadd.xlane.f32.xlu1 %v1263_v20 }
 0x5d4   : > { %v1244_v17 = vpop.xlane.xlu0 %1243 }
 0x5d5   : > { %v1266_v11 = vmul.f32 0.037037037, %v1244_v17 }
 0x5d6   : > { %v1247_v14 = vpop.xlane.xlu1 %1246 }
 0x5d7   : > { %v2522_v46 = vsub.f32 %v2482_v58, %v1266_v11  ;;  %v1267_v21 = vmul.f32 0.037037037, %v1247_v14 }
 0x5d8   : > { %v1250_v15 = vpop.xlane.xlu0 %1249 }
 0x5d9   : > { %v2525_v18 = vsub.f32 %v2488_v62, %v1267_v21  ;;  %v1268_v19 = vmul.f32 0.037037037, %v1250_v15  ;;  %v1282_v22 = vmul.f32 %v2522_v46, %v2522_v46 }
 0x5da   : > { %v1253_v23 = vpop.xlane.xlu1 %1252 }
 0x5db   : > { %v2530_v47 = vsub.f32 %v2485_v61, %v1268_v19  ;;  %v1269_v24 = vmul.f32 0.037037037, %v1253_v23  ;;  %v1290_v25 = vsel %vm529_vm0, %v1282_v22, 0.0  ;;  %v1283_v26 = vmul.f32 %v2525_v18, %v2525_v18 }
 0x5dc   : > { %1291 = vadd.xlane.f32.xlu0 %v1290_v25  ;;  %v1256_v56 = vpop.xlane.xlu0 %1255 }
 0x5dd   : > { %v2536_v27 = vsub.f32 %v2493_v0, %v1269_v24  ;;  %v1270_v30 = vmul.f32 0.037037037, %v1256_v56  ;;  %v1293_v57 = vsel %vm529_vm0, %v1283_v26, 0.0  ;;  %v1284_v12 = vmul.f32 %v2530_v47, %v2530_v47  ;;  %v1909_v26 = vld [vmem:[%s2704_s4] ss:$0 sm:$0xff] }
 0x5de   : > { %1294 = vadd.xlane.f32.xlu1 %v1293_v57  ;;  %v1259_v31 = vpop.xlane.xlu1 %1258 }
 0x5df   : > { %v2542_v32 = vsub.f32 %v2500_v10, %v1270_v30  ;;  %v1271_v33 = vmul.f32 0.037037037, %v1259_v31  ;;  %v1296_v34 = vsel %vm529_vm0, %v1284_v12, 0.0  ;;  %v1285_v35 = vmul.f32 %v2536_v27, %v2536_v27 }
 0x5e0   : > { %1297 = vadd.xlane.f32.xlu0 %v1296_v34  ;;  %v1262_v38 = vpop.xlane.xlu0 %1261 }
 0x5e1   : > { %v2548_v39 = vsub.f32 %v2508_v4, %v1271_v33  ;;  %v1272_v40 = vmul.f32 0.037037037, %v1262_v38  ;;  %v1299_v41 = vsel %vm529_vm0, %v1285_v35, 0.0  ;;  %v1286_v42 = vmul.f32 %v2542_v32, %v2542_v32  ;;  %v1910_v38 = vld [vmem:[%s2705_s5] ss:$0 sm:$0xff] }
 0x5e2   : > { %1300 = vadd.xlane.f32.xlu1 %v1299_v41  ;;  %v1265_v43 = vpop.xlane.xlu1 %1264 }
 0x5e3   : > { %v2554_v44 = vsub.f32 %v2505_v3, %v1272_v40  ;;  %v1273_v45 = vmul.f32 0.037037037, %v1265_v43  ;;  %v1302_v48 = vsel %vm529_vm0, %v1286_v42, 0.0  ;;  %v1287_v49 = vmul.f32 %v2548_v39, %v2548_v39 }
 0x5e4   : > { %1303 = vadd.xlane.f32.xlu0 %v1302_v48 }
 0x5e5   : > { %v2560_v50 = vsub.f32 %v2513_v7, %v1273_v45  ;;  %v1305_v51 = vsel %vm529_vm0, %v1287_v49, 0.0  ;;  %v1288_v52 = vmul.f32 %v2554_v44, %v2554_v44 }
 0x5e6   : > { %1306 = vadd.xlane.f32.xlu1 %v1305_v51 }
 0x5e7   : > { %v1308_v53 = vsel %vm529_vm0, %v1288_v52, 0.0  ;;  %v1289_v54 = vmul.f32 %v2560_v50, %v2560_v50 }
 0x5e8   : > { %1309 = vadd.xlane.f32.xlu0 %v1308_v53 }
 0x5e9   : > { %v1311_v55 = vsel %vm529_vm0, %v1289_v54, 0.0 }
 0x5ea   : > { %1312 = vadd.xlane.f32.xlu1 %v1311_v55 }
 0x669   : > { %v1292_v63 = vpop.xlane.xlu0 %1291 }
 0x66a   : > { %v1314_v1 = vmul.f32 0.037037037, %v1292_v63 }
 0x66b   : > { %v1295_v8 = vpop.xlane.xlu1 %1294 }
 0x66c   : > { %v1322_v2 = vadd.f32 1e-05, %v1314_v1  ;;  %v1315_v9 = vmul.f32 0.037037037, %v1295_v8 }
 0x66d   : > { %v1298_v36 = vpop.xlane.xlu0 %1297 }
 0x66e   : > { %2154 = vrsqrt.f32 %v1322_v2  ;;  %v1323_v29 = vadd.f32 1e-05, %v1315_v9  ;;  %v1316_v13 = vmul.f32 0.037037037, %v1298_v36 }
 0x66f   : > { %v1301_v5 = vpop.xlane.xlu1 %1300 }
 0x670   : > { %2156 = vrsqrt.f32 %v1323_v29  ;;  %v1324_v16 = vadd.f32 1e-05, %v1316_v13  ;;  %v1317_v37 = vmul.f32 0.037037037, %v1301_v5 }
 0x671   : > { %v1304_v20 = vpop.xlane.xlu0 %1303 }
 0x672   : > { %2158 = vrsqrt.f32 %v1324_v16  ;;  %v1325_v17 = vadd.f32 1e-05, %v1317_v37  ;;  %v1318_v11 = vmul.f32 0.037037037, %v1304_v20  ;;  %v1911_v37 = vld [vmem:[%s2707_s7] ss:$0 sm:$0xff] }
 0x673   : > { %v1307_v14 = vpop.xlane.xlu1 %1306 }
 0x674   : > { %2160 = vrsqrt.f32 %v1325_v17  ;;  %v1326_v21 = vadd.f32 1e-05, %v1318_v11  ;;  %v1319_v15 = vmul.f32 0.037037037, %v1307_v14 }
 0x675   : > { %v1310_v19 = vpop.xlane.xlu0 %1309 }
 0x676   : > { %2162 = vrsqrt.f32 %v1326_v21  ;;  %v1327_v22 = vadd.f32 1e-05, %v1319_v15  ;;  %v1320_v23 = vmul.f32 0.037037037, %v1310_v19 }
 0x677   : > { %v1313_v24 = vpop.xlane.xlu1 %1312 }
 0x678   : > { %v2155_v25 = vpop.eup %2154  ;;  %2164 = vrsqrt.f32 %v1327_v22  ;;  %v1328_v56 = vadd.f32 1e-05, %v1320_v23  ;;  %v1321_v30 = vmul.f32 0.037037037, %v1313_v24 }
 0x679   : > { %v1338_v57 = vmul.f32 %v2155_v25, %v2522_v46 }
 0x67a   : > { %v2157_v12 = vpop.eup %2156  ;;  %2166 = vrsqrt.f32 %v1328_v56  ;;  %v1329_v31 = vadd.f32 1e-05, %v1321_v30 }
 0x67b   : > { %v1339_v33 = vmul.f32 %v2157_v12, %v2525_v18  ;;  %v1352_v34 = vmul.f32 %v1909_v26, %v1338_v57 }
 0x67c   : > { %v2159_v35 = vpop.eup %2158  ;;  %2168 = vrsqrt.f32 %v1329_v31 }
 0x67d   : > { %v1340_v40 = vmul.f32 %v2159_v35, %v2530_v47  ;;  %v1353_v41 = vmul.f32 %v1909_v26, %v1339_v33  ;;  %v1366_v46 = vadd.f32 %v1910_v38, %v1352_v34 }
 0x67e   : > { %v2161_v42 = vpop.eup %2160 }
 0x67f   : > { %v1354_v43 = vmul.f32 %v1909_v26, %v1340_v40  ;;  %v1341_v45 = vmul.f32 %v2161_v42, %v2536_v27  ;;  %v1367_v48 = vadd.f32 %v1910_v38, %v1353_v41 }
 0x680   : > { %v2163_v49 = vpop.eup %2162 }
 0x681   : > { %v1355_v51 = vmul.f32 %v1909_v26, %v1341_v45  ;;  %v1342_v18 = vmul.f32 %v2163_v49, %v2542_v32  ;;  %v1374_v52 = vpack.c.bf16 %v1367_v48, %v1366_v46  ;;  %v1368_v54 = vadd.f32 %v1910_v38, %v1354_v43 }
 0x682   : > { %v2165_v53 = vpop.eup %2164 }
 0x683   : > { %v1369_v55 = vadd.f32 %v1910_v38, %v1355_v51  ;;  %v1343_v28 = vmul.f32 %v2165_v53, %v2548_v39  ;;  %2047 = vmatprep.mubr.msk.bf16.mxu0 %vm529_vm0, %v1374_v52  ;;  %v1356_v47 = vmul.f32 %v1909_v26, %v1342_v18 }
 0x684   : > { %v2167_v59 = vpop.eup %2166 }
 0x685   : > { %v1344_v60 = vmul.f32 %v2167_v59, %v2554_v44  ;;  %v1375_v63 = vpack.c.bf16 %v1369_v55, %v1368_v54  ;;  %v1357_v27 = vmul.f32 %v1909_v26, %v1343_v28  ;;  %v1370_v32 = vadd.f32 %v1910_v38, %v1356_v47  ;;  %v2104_v44 = vld [vmem:[%s2708_s8] sm:$0xff]  }
 0x686   : > { %v2169_v1 = vpop.eup %2168  ;;  %2055 = vmatprep.subr.bf16.mxu1 %v2104_v44 }
 0x687   : > { %v1345_v8 = vmul.f32 %v2169_v1, %v2560_v50  ;;  %2048 = vmatmul.mubr.msk.bf16.vlgmr.msra.gmra.mrb[24].mxu0 %vm529_vm0, %v1375_v63  ;;  %v1371_v2 = vadd.f32 %v1910_v38, %v1357_v27  ;;  %v1358_v9 = vmul.f32 %v1909_v26, %v1344_v60  ;;  %v2105_v50 = vld [vmem:[%s2708_s8 + $0x8] sm:$0x3f]   ;;  %2056 = vmatpush3.bf16.msra.mxu1 %v2104_v44 }
 0x688   : > { %v1591_v16 = vand.u32 %v2105_v50, %v2408_v6 }
 0x689   : > { %v1376_v36 = vpack.c.bf16 %v1371_v2, %v1370_v32  ;;  %v1359_v29 = vmul.f32 %v1909_v26, %v1345_v8  ;;  %v1372_v39 = vadd.f32 %v1910_v38, %v1358_v9 }
 0x68a   : > { %2057 = vmatprep.subr.bf16.mxu1 %v1591_v16 }
 0x68b   : > { %2051 = vmatprep.mubr.msk.bf16.mxu0 %vm529_vm0, %v1376_v36  ;;  %v1373_v13 = vadd.f32 %v1910_v38, %v1359_v29  ;;  %2058 = vmatpush3.bf16.msra.mxu1 %v1591_v16 }
 0x68d   : > { %v1377_v5 = vpack.c.bf16 %v1373_v13, %v1372_v39 }
 0x68f   : > { %2052 = vmatmul.mubr.msk.bf16.gmra.mrb[28].mxu0 %vm529_vm0, %v1377_v5 }
 0x75a   : > { %v2049_v20 = vpop.f32.mrb[24].mxu0 }
 0x75b   : > { %v2604_v17 = vadd.f32 %v2049_v20, %v1911_v37  ;;  %v1449_v11 = vpop.f32.mrb[25].mxu0 }
 0x75c   : > { %v2606_v14 = vadd.f32 %v1911_v37, %v1449_v11  ;;  %v2050_v21 = vpop.f32.mrb[26].mxu0 }
 0x75d   : > { %v1482_v15 = vmul.f32 %v2604_v17, %v2604_v17  ;;  %v2610_v19 = vadd.f32 %v2050_v21, %v1911_v37  ;;  %v1452_v22 = vpop.f32.mrb[27].mxu0 }
 0x75e   : > { %v1480_v6 = vmul.f32 %v2606_v14, %v2606_v14  ;;  %v2614_v23 = vadd.f32 %v1911_v37, %v1452_v22 }
 0x75f   : > { %v1490_v24 = vmul.f32 %v1482_v15, %v2604_v17  ;;  %v1483_v25 = vmul.f32 %v2610_v19, %v2610_v19 }
 0x760   : > { %v1488_v26 = vmul.f32 %v1480_v6, %v2606_v14  ;;  %v1481_v56 = vmul.f32 %v2614_v23, %v2614_v23 }
 0x761   : > { %v1498_v30 = vmul.f32 0.044715, %v1490_v24  ;;  %v1491_v57 = vmul.f32 %v1483_v25, %v2610_v19 }
 0x762   : > { %v1496_v12 = vmul.f32 0.044715, %v1488_v26  ;;  %v1489_v31 = vmul.f32 %v1481_v56, %v2614_v23  ;;  %v2053_v33 = vpop.f32.mrb[28].mxu0 }
 0x763   : > { %v1506_v34 = vadd.f32 %v1498_v30, %v2604_v17  ;;  %v1499_v35 = vmul.f32 0.044715, %v1491_v57  ;;  %v2625_v38 = vadd.f32 %v2053_v33, %v1911_v37  ;;  %v1465_v40 = vpop.f32.mrb[29].mxu0 }
 0x764   : > { %v1504_v41 = vadd.f32 %v1496_v12, %v2606_v14  ;;  %v1497_v42 = vmul.f32 0.044715, %v1489_v31  ;;  %v2628_v43 = vadd.f32 %v1911_v37, %v1465_v40  ;;  %v2054_v45 = vpop.f32.mrb[30].mxu0 }
 0x765   : > { %v1514_v46 = vmul.f32 0.7978846, %v1506_v34  ;;  %v1507_v48 = vadd.f32 %v1499_v35, %v2610_v19  ;;  %v1486_v49 = vmul.f32 %v2625_v38, %v2625_v38  ;;  %v2633_v51 = vadd.f32 %v2054_v45, %v1911_v37  ;;  %v1468_v18 = vpop.f32.mrb[31].mxu0 }
 0x766   : > { %v1512_v52 = vmul.f32 0.7978846, %v1504_v41  ;;  %v1505_v53 = vadd.f32 %v1497_v42, %v2614_v23  ;;  %v1484_v54 = vmul.f32 %v2628_v43, %v2628_v43  ;;  %v2638_v55 = vadd.f32 %v1911_v37, %v1468_v18 }
 0x767   : > { %2170 = vtanh.f32 %v1514_v46  ;;  %v1515_v28 = vmul.f32 0.7978846, %v1507_v48  ;;  %v1494_v47 = vmul.f32 %v1486_v49, %v2625_v38  ;;  %v1487_v59 = vmul.f32 %v2633_v51, %v2633_v51 }
 0x768   : > { %2172 = vtanh.f32 %v1512_v52  ;;  %v1513_v60 = vmul.f32 0.7978846, %v1505_v53  ;;  %v1492_v63 = vmul.f32 %v1484_v54, %v2628_v43  ;;  %v1485_v27 = vmul.f32 %v2638_v55, %v2638_v55 }
 0x769   : > { %2174 = vtanh.f32 %v1515_v28  ;;  %v1502_v1 = vmul.f32 0.044715, %v1494_v47  ;;  %v1495_v8 = vmul.f32 %v1487_v59, %v2633_v51 }
 0x76a   : > { %2176 = vtanh.f32 %v1513_v60  ;;  %v1500_v32 = vmul.f32 0.044715, %v1492_v63  ;;  %v1493_v2 = vmul.f32 %v1485_v27, %v2638_v55  ;;  %v1918_v63 = vld [vmem:[%s2709_s9] ss:$0 sm:$0xff] }
 0x76b   : > { %v1510_v9 = vadd.f32 %v1502_v1, %v2625_v38  ;;  %v1503_v36 = vmul.f32 0.044715, %v1495_v8 }
 0x76c   : > { %v1508_v29 = vadd.f32 %v1500_v32, %v2628_v43  ;;  %v1501_v39 = vmul.f32 0.044715, %v1493_v2 }
 0x76d   : > { %v1518_v13 = vmul.f32 0.7978846, %v1510_v9  ;;  %v1511_v5 = vadd.f32 %v1503_v36, %v2633_v51 }
 0x76e   : > { %v1516_v44 = vmul.f32 0.7978846, %v1508_v29  ;;  %v1509_v50 = vadd.f32 %v1501_v39, %v2638_v55 }
 0x76f   : > { %2178 = vtanh.f32 %v1518_v13  ;;  %v1519_v16 = vmul.f32 0.7978846, %v1511_v5 }
 0x770   : > { %2180 = vtanh.f32 %v1516_v44  ;;  %v1517_v37 = vmul.f32 0.7978846, %v1509_v50 }
 0x771   : > { %v2171_v20 = vpop.eup %2170  ;;  %2182 = vtanh.f32 %v1519_v16 }
 0x772   : > { %v2173_v11 = vpop.eup %2172  ;;  %v1530_v21 = vadd.f32 1.0, %v2171_v20  ;;  %2184 = vtanh.f32 %v1517_v37 }
 0x773   : > { %v2175_v15 = vpop.eup %2174  ;;  %v1528_v22 = vadd.f32 1.0, %v2173_v11 }
 0x774   : > { %v2177_v6 = vpop.eup %2176  ;;  %v1538_v24 = vmul.f32 0.5, %v1530_v21  ;;  %v1531_v25 = vadd.f32 1.0, %v2175_v15 }
 0x775   : > { %v1536_v26 = vmul.f32 0.5, %v1528_v22  ;;  %v1529_v56 = vadd.f32 1.0, %v2177_v6 }
 0x776   : > { %v1539_v30 = vmul.f32 0.5, %v1531_v25  ;;  %v1546_v12 = vmul.f32 %v1538_v24, %v2604_v17 }
 0x777   : > { %v1537_v57 = vmul.f32 0.5, %v1529_v56  ;;  %v1544_v34 = vmul.f32 %v1536_v26, %v2606_v14 }
 0x778   : > { %v1547_v31 = vmul.f32 %v1539_v30, %v2610_v19 }
 0x779   : > { %v2179_v33 = vpop.eup %2178  ;;  %v1545_v35 = vmul.f32 %v1537_v57, %v2614_v23 }
 0x77a   : > { %v2181_v40 = vpop.eup %2180  ;;  %v1553_v41 = vpack.c.bf16 %v1547_v31, %v1546_v12  ;;  %v1534_v42 = vadd.f32 1.0, %v2179_v33 }
 0x77b   : > { %v2183_v45 = vpop.eup %2182  ;;  %v1532_v46 = vadd.f32 1.0, %v2181_v40  ;;  %v1552_v48 = vpack.c.bf16 %v1545_v35, %v1544_v34 }
 0x77c   : > { %v2185_v49 = vpop.eup %2184  ;;  %v1542_v18 = vmul.f32 0.5, %v1534_v42  ;;  %v1535_v52 = vadd.f32 1.0, %v2183_v45 }
 0x77d   : > { %v1540_v53 = vmul.f32 0.5, %v1532_v46  ;;  %v1533_v54 = vadd.f32 1.0, %v2185_v49  ;;  %2059 = vmatprep.mubr.msk.bf16.mxu1 %vm529_vm0, %v1552_v48 }
 0x77e   : > { %v1543_v17 = vmul.f32 0.5, %v1535_v52  ;;  %2060 = vmatmul.mubr.msk.bf16.vlgmr.msra.gmra.mrb[16].mxu1 %vm529_vm0, %v1553_v41  ;;  %v1550_v14 = vmul.f32 %v1542_v18, %v2625_v38 }
 0x77f   : > { %v1541_v19 = vmul.f32 0.5, %v1533_v54  ;;  %v1548_v28 = vmul.f32 %v1540_v53, %v2628_v43 }
 0x780   : > { %v1551_v23 = vmul.f32 %v1543_v17, %v2633_v51 }
 0x781   : > { %v1549_v47 = vmul.f32 %v1541_v19, %v2638_v55 }
 0x782   : > { %v1555_v59 = vpack.c.bf16 %v1551_v23, %v1550_v14 }
 0x783   : > { %v1554_v60 = vpack.c.bf16 %v1549_v47, %v1548_v28 }
 0x785   : > { %2063 = vmatprep.mubr.msk.bf16.mxu1 %vm529_vm0, %v1554_v60 }
 0x786   : > { %2064 = vmatmul.mubr.msk.bf16.gmra.mrb[20].mxu1 %vm529_vm0, %v1555_v59 }
 0x851   : > { %v2061_v38 = vpop.f32.mrb[16].mxu1 }
 0x852   : > { %v1636_v51 = vadd.f32 %v2061_v38, %v1918_v63  ;;  %v1627_v27 = vpop.f32.mrb[17].mxu1 }
 0x853   : > { %v1628_v43 = vadd.f32 %v1918_v63, %v1627_v27  ;;  %v2062_v1 = vpop.f32.mrb[18].mxu1 }
 0x854   : > { %v1660_v55 = vadd.f32 %v1636_v51, %v2485_v61  ;;  %v1639_v8 = vadd.f32 %v2062_v1, %v1918_v63  ;;  %v1630_v32 = vpop.f32.mrb[19].mxu1 }
 0x855   : > { %v1658_v2 = vadd.f32 %v1628_v43, %v2482_v58  ;;  %v1631_v9 = vadd.f32 %v1918_v63, %v1630_v32 }
 0x856   : > { %1668 = vst.msk [vmem:[%s2290_s23 + $0x10] sm:$0xff] %vm529_vm0, %v1660_v55  ;;  %v1661_v36 = vadd.f32 %v1639_v8, %v2493_v0 }
 0x857   : > { %1666 = vst.msk [vmem:[%s2290_s23] sm:$0xff] %vm529_vm0, %v1658_v2  ;;  %v1659_v29 = vadd.f32 %v1631_v9, %v2488_v62 }
 0x858   : > { %1669 = vst.msk [vmem:[%s2290_s23 + $0x18] sm:$0xff] %vm529_vm0, %v1661_v36 }
 0x859   : > { %1667 = vst.msk [vmem:[%s2290_s23 + $0x8] sm:$0xff] %vm529_vm0, %v1659_v29  ;;  %v2065_v61 = vpop.f32.mrb[20].mxu1 }
 0x85a   : > { %v1652_v39 = vadd.f32 %v2065_v61, %v1918_v63  ;;  %v1643_v58 = vpop.f32.mrb[21].mxu1 }
 0x85b   : > { %v1644_v13 = vadd.f32 %v1918_v63, %v1643_v58  ;;  %v2066_v5 = vpop.f32.mrb[22].mxu1 }
 0x85c   : > { %v1664_v44 = vadd.f32 %v1652_v39, %v2505_v3  ;;  %v1655_v50 = vadd.f32 %v2066_v5, %v1918_v63  ;;  %v1646_v0 = vpop.f32.mrb[23].mxu1 }
 0x85d   : > { %v1662_v16 = vadd.f32 %v1644_v13, %v2500_v10  ;;  %v1647_v37 = vadd.f32 %v1918_v63, %v1646_v0 }
 0x85e   : > { %1672 = vst.msk [vmem:[%s2290_s23 + $0x30] sm:$0xff] %vm529_vm0, %v1664_v44  ;;  %v1665_v62 = vadd.f32 %v1655_v50, %v2513_v7 }
 0x85f   : > { %1670 = vst.msk [vmem:[%s2290_s23 + $0x20] sm:$0xff] %vm529_vm0, %v1662_v16  ;;  %v1663_v20 = vadd.f32 %v1647_v37, %v2508_v4 }
 0x860   : > { %1673 = vst.msk [vmem:[%s2290_s23 + $0x38] sm:$0xff] %vm529_vm0, %v1665_v62 }
 0x861   : > { %1671 = vst.msk [vmem:[%s2290_s23 + $0x28] sm:$0xff] %vm529_vm0, %v1663_v20 }
 0x862 PF: > { %s20_s15 = sadd.s32 1, %s2208_s15   ;;  %s2711_s13 = smov %s2204_s14 }
 0x863   : > { %p17_p5 = scmp.ge.s32.totalorder %s20_s15, 4   ;;  %s2712_s14 = smov %s2714_s16 }
 0x865   :  { %19 = sbr.rel (!%p17_p5) target bundleno = 2 (0x2), region = 123 }

// kernel: t2t_vit_forward.4
= control target key start
LH: loop header
LB: loop body
LE: loop exit
PB: predicated region body
PF: predicated region fallthrough
CT: control target
= control target key end

     0   :  { %vm165_vm0 = vcmask 1040384   ;;  %vm166_vm1 = vcmask 1041408   ;;  %v310_v17 = vmov 65535   ;;  %vm158_vm2 = vcmask 941056   ;;  %s418_s1 = inlined_call_operand.vmem [shape: bf16[243,32], index: 1, kind: input, shape index: {}]   ;;  %s419_s0 = inlined_call_operand.vmem [shape: f32[32,243], index: 0, kind: input, shape index: {}]   ;;  %s420_s2 = inlined_call_operand.vmem [shape: f32[1,32], index: 2, kind: input, shape index: {}]   ;;  %s421_s3 = inlined_call_operand.vmem [shape: f32[32,32], index: 3, kind: output, shape index: {}]  }
   0x1   :  { %v294_v0 = vld [vmem:[%s418_s1 + $0x40] sm:$0xff]   ;;  %v296_v2 = vld [vmem:[%s418_s1 + $0x48] sm:$0xff]   ;;  %v298_v4 = vld [vmem:[%s418_s1 + $0x50] sm:$0xff]   ;;  %v167_v18 = vsel %vm165_vm0, 4294967295, %v310_v17  ;;  %vm221_vm3 = vcmask 261120  }
   0x2   :  { %v295_v1 = vld [vmem:[%s418_s1] sm:$0xff]   ;;  %249 = vmatprep.subr.bf16.mxu0 %v294_v0  ;;  %277 = vmatprep.subr.bf16.mxu1 %v294_v0  ;;  %v297_v3 = vld [vmem:[%s418_s1 + $0x8] sm:$0xff]   ;;  %v299_v5 = vld [vmem:[%s418_s1 + $0x10] sm:$0xff]   ;;  %v168_v22 = vsel %vm166_vm1, %v167_v18, 0 }
   0x3   :  { %250 = vmatpush3.bf16.msra.mxu0 %v295_v1  ;;  %285 = vmatpush3.bf16.msra.mxu1 %v295_v1  ;;  %v300_v6 = vld [vmem:[%s418_s1 + $0x58] sm:$0xff]   ;;  %v302_v8 = vld [vmem:[%s418_s1 + $0x60] sm:$0xff]   ;;  %v304_v10 = vld [vmem:[%s418_s1 + $0x68] sm:$0xff]  }
   0x4   :  { %251 = vmatprep.subr.bf16.mxu0 %v296_v2  ;;  %278 = vmatprep.subr.bf16.mxu1 %v296_v2  ;;  %v301_v7 = vld [vmem:[%s418_s1 + $0x18] sm:$0xff]   ;;  %v303_v9 = vld [vmem:[%s418_s1 + $0x20] sm:$0xff]   ;;  %v16_v11 = vld [vmem:[%s419_s0 + $0x8] sm:$0xff] }
   0x5   :  { %v18_v12 = vld [vmem:[%s419_s0 + $0x18] sm:$0xff]  ;;  %v20_v13 = vld [vmem:[%s419_s0 + $0x28] sm:$0xff]  ;;  %v306_v20 = vld [vmem:[%s418_s1 + $0x70] sm:$0xff]  }
   0x6   :  { %v22_v14 = vld [vmem:[%s419_s0 + $0x38] sm:$0xff]  ;;  %v24_v15 = vpack.c.bf16 %v18_v12, %v16_v11  ;;  %v305_v19 = vld [vmem:[%s418_s1 + $0x28] sm:$0xff]   ;;  %v307_v23 = vld [vmem:[%s418_s1 + $0x30] sm:$0xff]  }
   0x7   :  { %252 = vmatpush3.bf16.msra.mxu0 %v297_v3  ;;  %286 = vmatpush3.bf16.msra.mxu1 %v297_v3  ;;  %v26_v16 = vpack.c.bf16 %v22_v14, %v20_v13  ;;  %v308_v21 = vld [vmem:[%s418_s1 + $0x78] ss:$0 sps:$4 sm:$0x33]   ;;  %v15_v26 = vld [vmem:[%s419_s0] sm:$0xff]  ;;  %v17_v27 = vld [vmem:[%s419_s0 + $0x10] sm:$0xff] }
   0x8   :  { %253 = vmatprep.subr.bf16.mxu0 %v298_v4  ;;  %279 = vmatprep.subr.bf16.mxu1 %v298_v4  ;;  %v170_v24 = vand.u32 %v308_v21, %v168_v22  ;;  %v309_v25 = vld [vmem:[%s418_s1 + $0x38] sm:$0xff]   ;;  %v19_v28 = vld [vmem:[%s419_s0 + $0x20] sm:$0xff]  ;;  %v21_v29 = vld [vmem:[%s419_s0 + $0x30] sm:$0xff]  ;;  %v23_v30 = vpack.c.bf16 %v17_v27, %v15_v26 }
   0x9   :  { %247 = vmatprep.mubr.msk.bf16.mxu0 %vm158_vm2, %v24_v15  ;;  %248 = vmatprep.mubr.msk.bf16.mxu1 %vm158_vm2, %v26_v16  ;;  %v25_v31 = vpack.c.bf16 %v21_v29, %v19_v28  ;;  %v230_v34 = vld [vmem:[%s420_s2] ss:$0 sm:$0xff] }
   0xb   :  { %254 = vmatpush3.bf16.msra.mxu0 %v299_v5  ;;  %287 = vmatpush3.bf16.msra.mxu1 %v299_v5 }
   0xc   :  { %255 = vmatprep.subr.bf16.mxu0 %v300_v6  ;;  %280 = vmatprep.subr.bf16.mxu1 %v300_v6 }
   0xf   :  { %256 = vmatpush3.bf16.msra.mxu0 %v301_v7  ;;  %288 = vmatpush3.bf16.msra.mxu1 %v301_v7 }
  0x10   :  { %257 = vmatprep.subr.bf16.mxu0 %v302_v8  ;;  %281 = vmatprep.subr.bf16.mxu1 %v302_v8 }
  0x13   :  { %258 = vmatpush3.bf16.msra.mxu0 %v303_v9  ;;  %289 = vmatpush3.bf16.msra.mxu1 %v303_v9 }
  0x14   :  { %259 = vmatprep.subr.bf16.mxu0 %v304_v10  ;;  %282 = vmatprep.subr.bf16.mxu1 %v304_v10 }
  0x17   :  { %260 = vmatpush3.bf16.msra.mxu0 %v305_v19  ;;  %290 = vmatpush3.bf16.msra.mxu1 %v305_v19 }
  0x18   :  { %261 = vmatprep.subr.bf16.mxu0 %v306_v20  ;;  %283 = vmatprep.subr.bf16.mxu1 %v306_v20 }
  0x1b   :  { %262 = vmatpush3.bf16.msra.mxu0 %v307_v23  ;;  %291 = vmatpush3.bf16.msra.mxu1 %v307_v23 }
  0x1c   :  { %263 = vmatprep.subr.bf16.mxu0 %v170_v24  ;;  %284 = vmatprep.subr.bf16.mxu1 %v170_v24 }
  0x1f   :  { %264 = vmatpush3.bf16.msra.mxu0 %v309_v25  ;;  %292 = vmatpush3.bf16.msra.mxu1 %v309_v25 }
  0x22   :  { %205 = vmatmul.mubr.bf16.vlgmr.msra.gmra.mrb[0].mxu0 %v23_v30  ;;  %213 = vmatmul.mubr.bf16.vlgmr.msra.gmra.mrb[0].mxu1 %v25_v31 }
  0xf5   :  { %v265_v32 = vpop.f32.mrb[0].mxu0  ;;  %v271_v33 = vpop.f32.mrb[0].mxu1 }
  0xf6   :  { %v266_v35 = vpop.f32.mrb[1].mxu0  ;;  %v272_v36 = vpop.f32.mrb[1].mxu1 }
  0xf7   :  { %v267_v37 = vadd.f32 %v266_v35, %v265_v32  ;;  %v273_v38 = vadd.f32 %v272_v36, %v271_v33  ;;  %v268_v39 = vpop.f32.mrb[2].mxu0  ;;  %v274_v40 = vpop.f32.mrb[2].mxu1 }
  0xf8   :  { %v269_v41 = vpop.f32.mrb[3].mxu0  ;;  %v275_v42 = vpop.f32.mrb[3].mxu1 }
  0xf9   :  { %v207_v43 = vadd.f32 %v267_v37, %v230_v34  ;;  %v215_v44 = vadd.f32 %v273_v38, %v230_v34  ;;  %v270_v45 = vadd.f32 %v269_v41, %v268_v39  ;;  %v276_v46 = vadd.f32 %v275_v42, %v274_v40 }
  0xfb   :  { %222 = vst.msk [vmem:[%s421_s3] sm:$0xff] %vm221_vm3, %v207_v43  ;;  %224 = vst.msk [vmem:[%s421_s3 + $0x10] sm:$0xff] %vm221_vm3, %v215_v44  ;;  %v210_v47 = vadd.f32 %v270_v45, %v230_v34  ;;  %v218_v48 = vadd.f32 %v276_v46, %v230_v34 }
  0xfd   :  { %223 = vst.msk [vmem:[%s421_s3 + $0x8] sm:$0xff] %vm221_vm3, %v210_v47  ;;  %225 = vst.msk [vmem:[%s421_s3 + $0x18] sm:$0xff] %vm221_vm3, %v218_v48 }

// kernel: t2t_vit_forward.5
= control target key start
LH: loop header
LB: loop body
LE: loop exit
PB: predicated region body
PF: predicated region fallthrough
CT: control target
= control target key end

     0   :  { %s2476_s21 = smov 0   ;;  %s2478_s22 = smov 0   ;;  %s2780_s0 = inlined_call_operand.vmem [shape: f32[2,17,32], index: 0, kind: input, shape index: {}]   ;;  %s2781_s1 = inlined_call_operand.vmem [shape: f32[2,1,32], index: 1, kind: input, shape index: {}]   ;;  %s2782_s2 = inlined_call_operand.vmem [shape: f32[2,1,32], index: 2, kind: input, shape index: {}]   ;;  %s2783_s3 = inlined_call_operand.vmem [shape: bf16[2,6,32,16], index: 3, kind: input, shape index: {}]   ;;  %s2784_s4 = inlined_call_operand.vmem [shape: bf16[2,2,16,32], index: 4, kind: input, shape index: {}]   ;;  %s2785_s5 = inlined_call_operand.vmem [shape: f32[2,1,32], index: 5, kind: input, shape index: {}]   ;;  %s2786_s6 = inlined_call_operand.vmem [shape: f32[2,1,32], index: 6, kind: input, shape index: {}]   ;;  %s2787_s7 = inlined_call_operand.vmem [shape: f32[2,1,32], index: 7, kind: input, shape index: {}]   ;;  %s2788_s8 = inlined_call_operand.vmem [shape: bf16[2,32,64], index: 8, kind: input, shape index: {}]   ;;  %s2789_s9 = inlined_call_operand.vmem [shape: f32[2,1,64], index: 9, kind: input, shape index: {}]   ;;  %s2790_s10 = inlined_call_operand.vmem [shape: bf16[2,64,32], index: 10, kind: input, shape index: {}]   ;;  %s2791_s11 = inlined_call_operand.vmem [shape: f32[2,1,32], index: 11, kind: input, shape index: {}]   ;;  %s2792_s12 = inlined_call_operand.vmem [shape: f32[2,17,32], index: 12, kind: output, shape index: {}]  }
   0x1   :  { %2797 = sst [smem:[#allocation8_spill]] %s2780_s0  ;;  %s2480_s23 = smov 0  }
   0x2   :  { %2798 = sst [smem:[#allocation9_spill]] %s2783_s3  ;;  %s2482_s24 = smov 0  }
   0x3   :  { %2799 = sst [smem:[#allocation10_spill]] %s2784_s4  ;;  %s2484_s25 = smov 0  }
   0x4   :  { %2800 = sst [smem:[#allocation11_spill]] %s2792_s12 }
   0x5 LB: > { %2801 = sst [smem:[#allocation2_spill]] %s2392_s21  ;;  %s31_s26 = sadd.s32 1, %s2400_s23  ;;  %s2408_s25 = sphi %s2484_s25, %s22_s25   ;;  %s2404_s24 = sphi %s2482_s24, %s2821_s24   ;;  %s2400_s23 = sphi %s2480_s23, %s2820_s23   ;;  %s2396_s22 = sphi %s2478_s22, %s2819_s22   ;;  %s2392_s21 = sphi %s2476_s21, %s2818_s21  }
   0x6   : > { %2802 = sst [smem:[#allocation3_spill]] %s2400_s23  ;;  %s34_s27 = sadd.s32 1, %s2404_s24 }
   0x7   : > { %2803 = sst [smem:[#allocation4_spill]] %s2404_s24  ;;  %p32_p0 = scmp.ge.s32.totalorder %s31_s26, 2 }
   0x8   : > { %2804 = sst [smem:[#allocation5_spill]] %s2408_s25  ;;  %p2000_p1 = scmp.ge.s32.totalorder %s2408_s25, 1 }
   0x9   : > { %p470_p2 = scmp.lt.s32.totalorder %s2408_s25, 5  ;;  %s2823_s26 = smov (%p32_p0, %s31_s26), 0 }
   0xa   : > { %2805 = sst [smem:[#allocation6_spill]] %s2823_s26  ;;  %s2825_s27 = smov (!%p32_p0, %s34_s27), %s2404_s24 }
   0xb   : > { %p471_p3 = pnand %p2000_p1, %p470_p2  ;;  %p36_p4 = scmp.ge.s32.totalorder %s2825_s27, 2 }
   0xc   : > { %p553_p5 = scmp.lt.s32.totalorder (!%p471_p3), %s2396_s22, 1  ;;  %p558_p6 = scmp.lt.s32.totalorder (!%p471_p3), %s2392_s21, 1 }
   0xd   : > { %s2827_s27 = smov (%p36_p4, %s2825_s27), 0  ;;  %474 = sbr.rel (%p471_p3) target bundleno = 3348 (0xd14), region = 68 }
   0xe   : > { %2806 = sst [smem:[#allocation7_spill]] %s2827_s27  ;;  %s2807_s0 = sld [smem:[#allocation8_spill]] (!%p471_p3) }
   0xf   : > { %s2808_s3 = sld [smem:[#allocation9_spill]] (!%p471_p3)  ;;  %s2809_s4 = sld [smem:[#allocation10_spill]] (!%p471_p3) }
  0x14   : > { %s2829_s22 = smov (!%p553_p5, %s2396_s22), 1 }
  0x15   : > { %s2510_s28 = scalar_select %p558_p6, %s2392_s21, 1 }
  0x16   : > { %s2265_s29 = smul.u32 24, %s2829_s22 }
  0x17   : > { %s2266_s27 = smul.u32 96, %s2510_s28  ;;  %s2090_s26 = sshll.u32 %s2510_s28, 4 }
  0x18   : > { %s557_s20 = scalar_lea.vmem %s2807_s0, %s2265_s29  ;;  %s2537_s15 = scalar_lea.vmem %s2809_s4, %s2090_s26 }
  0x19   : > { %s2532_s12 = scalar_lea.vmem %s2808_s3, %s2266_s27  ;;  %s2550_s25 = scalar_lea.vmem %s2788_s8, %s2090_s26 }
  0x1a   : > { %s590_s22 = scalar_lea.vmem %s2789_s9, %s2510_s28  ;;  %s2092_s30 = sshll.u32 %s2510_s28, 5 }
  0x1b   : > { %s598_s4 = scalar_lea.vmem %s2791_s11, %s2510_s28  ;;  %s2564_s18 = scalar_lea.vmem %s2790_s10, %s2092_s30 }
  0x1c   : > { %s2810_s0 = sld [smem:[#allocation11_spill]]  ;;  %s2811_s26 = sld [smem:[#allocation2_spill]] }
  0x22   : > { %s2569_s23 = scalar_lea.vmem %s2810_s0, %s2265_s29  ;;  %p2010_p7 = scmp.ne.s32.totalorder %s2811_s26, 0 }
  0x23   : > { %v609_v0 = vld [vmem:[%s557_s20] sm:$0xff] (!%p2010_p7)  ;;  %vm612_vm0 = vcmask (!%p2010_p7), 261120   ;;  %v610_v1 = vld [vmem:[%s557_s20 + $0x8] sm:$0xff] (!%p2010_p7)  ;;  %v611_v2 = vld [vmem:[%s557_s20 + $0x10] sm:$0x1] (!%p2010_p7)  ;;  %vm615_vm1 = vcmask (!%p2010_p7), 253952  }
  0x24   : > { %608 = sbr.rel (%p2010_p7) target bundleno = 43 (0x2b), region = 72  ;;  %613 = vst.msk [vmem:[%s2569_s23] sm:$0xff] (!%p2010_p7), %vm612_vm0, %v609_v0  ;;  %614 = vst.msk [vmem:[%s2569_s23 + $0x8] sm:$0xff] (!%p2010_p7), %vm612_vm0, %v610_v1 }
  0x25   : > { %616 = vst.msk [vmem:[%s2569_s23 + $0x10] sm:$0x1] (!%p2010_p7), %vm615_vm1, %v611_v2 }
  0x2b PF: > { %v2576_v3 = vld [vmem:[%s2569_s23] sm:$0xff]  ;;  %vm622_vm2 = vcmask 261120   ;;  %vm629_vm3 = vcmask 253952   ;;  %v2582_v5 = vld [vmem:[%s2569_s23 + $0x8] sm:$0xff]  ;;  %s2812_s29 = scalar_lea.vmem %s2781_s1, %s2510_s28  ;;  %s2813_s21 = scalar_lea.vmem %s2782_s2, %s2510_s28  ;;  %vm889_vm4 = vcmask 130048   ;;  %vm998_vm5 = vcmask 1040384  }
  0x2c   : > { %v2579_v4 = vld [vmem:[%s2569_s23 + $0x10] sm:$0x1]  ;;  %v623_v6 = vsel %vm622_vm2, %v2576_v3, 0.0  ;;  %v626_v8 = vsel %vm622_vm2, %v2582_v5, 0.0  ;;  %v2308_v24 = vld [vmem:[%s2532_s12] sm:$0xff]   ;;  %v2310_v26 = vld [vmem:[%s2532_s12 + $0x8] sm:$0xff]   ;;  %s2814_s27 = scalar_lea.vmem %s2785_s5, %s2510_s28  ;;  %s2816_s14 = scalar_lea.vmem %s2787_s7, %s2510_s28 }
  0x2d   : > { %v630_v7 = vsel %vm629_vm3, %v2579_v4, 0.0  ;;  %624 = vadd.xlane.f32.xlu0 %v623_v6  ;;  %v2309_v25 = vld [vmem:[%s2532_s12 + $0x20] sm:$0xff]   ;;  %2149 = vmatprep.subr.bf16.mxu0 %v2308_v24  ;;  %v2311_v27 = vld [vmem:[%s2532_s12 + $0x28] sm:$0xff]   ;;  %vm953_vm6 = vcmask 138240   ;;  %vm960_vm7 = vcmask 131072   ;;  %vm1758_vm8 = vcmask 523264  }
  0x2e   : > { %631 = vadd.xlane.f32.xlu1 %v630_v7  ;;  %2157 = vmatprep.subr.bf16.mxu1 %v2309_v25  ;;  %v2312_v28 = vld [vmem:[%s2532_s12 + $0x40] sm:$0xff]   ;;  %v2313_v54 = vld [vmem:[%s2532_s12 + $0x48] sm:$0xff]  }
  0x2f   : > { %2150 = vmatpush3.bf16.msra.mxu0 %v2308_v24  ;;  %2158 = vmatpush3.bf16.msra.mxu1 %v2309_v25  ;;  %v2011_v40 = vld [vmem:[%s2812_s29] ss:$0 sm:$0xff] }
  0x30   : > { %2151 = vmatprep.subr.bf16.mxu0 %v2310_v26  ;;  %2159 = vmatprep.subr.bf16.mxu1 %v2311_v27  ;;  %v2012_v46 = vld [vmem:[%s2813_s21] ss:$0 sm:$0xff] }
  0x31   : > { %627 = vadd.xlane.f32.xlu0 %v626_v8 }
  0x33   : > { %2152 = vmatpush3.bf16.msra.mxu0 %v2310_v26  ;;  %2160 = vmatpush3.bf16.msra.mxu1 %v2311_v27 }
  0x34   : > { %2165 = vmatprep.subr.bf16.mxu0 %v2312_v28 }
  0xba   : > { %v625_v9 = vpop.xlane.xlu0 %624 }
  0xbb   : > { %v632_v10 = vpop.xlane.xlu1 %631  ;;  %v634_v11 = vmul.f32 0.03125, %v625_v9 }
  0xbc   : > { %v636_v12 = vmul.f32 0.03125, %v632_v10  ;;  %v2410_v10 = vmov 0  }
  0xbd   : > { %v637_v13 = vsub.f32 %v2576_v3, %v634_v11  ;;  %v1000_v11 = vsel %vm998_vm5, 65535, %v2410_v10 }
  0xbe   : > { %v639_v14 = vsub.f32 %v2579_v4, %v636_v12  ;;  %v628_v15 = vpop.xlane.xlu0 %627 }
  0xbf   : > { %v635_v16 = vmul.f32 0.03125, %v628_v15  ;;  %v640_v17 = vmul.f32 %v637_v13, %v637_v13 }
  0xc0   : > { %v642_v18 = vmul.f32 %v639_v14, %v639_v14 }
  0xc1   : > { %v638_v19 = vsub.f32 %v2582_v5, %v635_v16  ;;  %v643_v20 = vsel %vm622_vm2, %v640_v17, 0.0 }
  0xc2   : > { %644 = vadd.xlane.f32.xlu1 %v643_v20  ;;  %v649_v21 = vsel %vm629_vm3, %v642_v18, 0.0  ;;  %v2315_v18 = vld [vmem:[%s2532_s12 + $0x18] sm:$0xff]  }
  0xc3   : > { %v641_v22 = vmul.f32 %v638_v19, %v638_v19  ;;  %v2317_v20 = vld [vmem:[%s2532_s12 + $0x58] sm:$0xff]  }
  0xc5   : > { %v646_v23 = vsel %vm622_vm2, %v641_v22, 0.0 }
  0xc6   : > { %650 = vadd.xlane.f32.xlu1 %v649_v21  ;;  %647 = vadd.xlane.f32.xlu0 %v646_v23 }
 0x14f   : > { %v645_v29 = vpop.xlane.xlu1 %644 }
 0x150   : > { %v652_v30 = vmul.f32 0.03125, %v645_v29 }
 0x152   : > { %v655_v31 = vadd.f32 1e-05, %v652_v30 }
 0x153   : > { %v651_v32 = vpop.xlane.xlu1 %650  ;;  %v648_v33 = vpop.xlane.xlu0 %647 }
 0x154   : > { %2328 = vrsqrt.f32 %v655_v31  ;;  %v654_v34 = vmul.f32 0.03125, %v651_v32  ;;  %v653_v35 = vmul.f32 0.03125, %v648_v33 }
 0x156   : > { %v657_v36 = vadd.f32 1e-05, %v654_v34  ;;  %v656_v37 = vadd.f32 1e-05, %v653_v35 }
 0x158   : > { %2330 = vrsqrt.f32 %v657_v36 }
 0x159   : > { %2332 = vrsqrt.f32 %v656_v37 }
 0x15e   : > { %v2329_v38 = vpop.eup %2328 }
 0x15f   : > { %v661_v39 = vmul.f32 %v2329_v38, %v637_v13 }
 0x161   : > { %v670_v44 = vmul.f32 %v2011_v40, %v661_v39 }
 0x162   : > { %v2331_v41 = vpop.eup %2330 }
 0x163   : > { %v2333_v42 = vpop.eup %2332  ;;  %v663_v43 = vmul.f32 %v2331_v41, %v639_v14  ;;  %v679_v50 = vadd.f32 %v2012_v46, %v670_v44  ;;  %v2314_v14 = vld [vmem:[%s2532_s12 + $0x10] sm:$0xff]  }
 0x164   : > { %v662_v45 = vmul.f32 %v2333_v42, %v638_v19  ;;  %v2316_v19 = vld [vmem:[%s2532_s12 + $0x50] sm:$0xff]  }
 0x165   : > { %v672_v47 = vmul.f32 %v2011_v40, %v663_v43 }
 0x166   : > { %v671_v48 = vmul.f32 %v2011_v40, %v662_v45 }
 0x167   : > { %v681_v49 = vadd.f32 %v2012_v46, %v672_v47 }
 0x168   : > { %v680_v51 = vadd.f32 %v2012_v46, %v671_v48 }
 0x169   : > { %v2611_v52 = vpack.c.bf16 %v681_v49, %v681_v49 }
 0x16a   : > { %v2613_v53 = vpack.c.bf16 %v680_v51, %v679_v50 }
 0x16c   : > { %2153 = vmatprep.mubr.msk.bf16.mxu0 %vm622_vm2, %v2613_v53  ;;  %2161 = vmatprep.mubr.msk.bf16.mxu1 %vm622_vm2, %v2613_v53 }
 0x16d   : > { %2154 = vmatmul.mubr.msk.bf16.vlgmr.msra.gmra.mrb[0].mxu0 %vm622_vm2, %v2611_v52  ;;  %2162 = vmatmul.mubr.msk.bf16.vlgmr.msra.gmra.mrb[0].mxu1 %vm622_vm2, %v2611_v52 }
 0x16e   : > { %2166 = vmatpush3.bf16.msra.mxu0 %v2312_v28  ;;  %2169 = vmatprep.mubr.msk.bf16.mxu0 %vm622_vm2, %v2613_v53 }
 0x16f   : > { %2167 = vmatprep.subr.bf16.mxu0 %v2313_v54 }
 0x172   : > { %2168 = vmatpush3.bf16.msra.mxu0 %v2313_v54 }
 0x175   : > { %2170 = vmatmul.mubr.msk.bf16.vlgmr.msra.gmra.mrb[4].mxu0 %vm622_vm2, %v2611_v52 }
 0x240   : > { %v2155_v55 = vpop.f32.mrb[0].mxu0  ;;  %v2163_v56 = vpop.f32.mrb[0].mxu1 }
 0x241   : > { %v741_v57 = vpop.f32.mrb[1].mxu0  ;;  %v806_v58 = vpop.f32.mrb[1].mxu1  ;;  %v888_v1 = vpack.c.bf16 %v2163_v56, %v2163_v56  ;;  %v886_v17 = vpack.c.bf16 %v2155_v55, %v2155_v55 }
 0x242   : > { %v2156_v59 = vpop.f32.mrb[2].mxu0  ;;  %v2164_v60 = vpop.f32.mrb[2].mxu1 }
 0x243   : > { %v744_v61 = vpop.f32.mrb[3].mxu0  ;;  %v809_v62 = vpop.f32.mrb[3].mxu1  ;;  %v900_v15 = vsel %vm889_vm4, %v888_v1, 0  ;;  %v2318_v60 = vld [vmem:[%s2537_s15] sm:$0xff]  }
 0x244   : > { %v885_v63 = vpack.c.bf16 %v744_v61, %v741_v57  ;;  %v887_v0 = vpack.c.bf16 %v809_v62, %v806_v58 }
 0x246   : > { %v897_v2 = vsel %vm889_vm4, %v887_v0, 0  ;;  %2261 = vmatprep.subr.msk.bf16.mxu1 %vm889_vm4, %v887_v0  ;;  %2177 = vmatprep.mubr.msk.bf16.mxu1 %vm889_vm4, %v885_v63 }
 0x247   : > { %2174 = vmatpush3.bf16.xpose.msra.mxu1 %v897_v2 }
 0x248   : > { %v2171_v6 = vpop.f32.mrb[4].mxu0  ;;  %2262 = vmatprep.subr.msk.bf16.mxu1 %vm889_vm4, %v888_v1 }
 0x249   : > { %v871_v7 = vpop.f32.mrb[5].mxu0  ;;  %v991_v8 = vpack.c.bf16 %v2171_v6, %v2171_v6 }
 0x24a   : > { %v2172_v9 = vpop.f32.mrb[6].mxu0 }
 0x24b   : > { %v874_v12 = vpop.f32.mrb[7].mxu0  ;;  %v1002_v16 = vand.u32 %v1000_v11, %v991_v8 }
 0x24c   : > { %v990_v13 = vpack.c.bf16 %v874_v12, %v871_v7 }
 0x24e   : > { %2181 = vmatprep.subr.bf16.mxu0 %v990_v13 }
 0x24f   : > { %2176 = vmatpush3.bf16.xpose.msra.mxu1 %v900_v15  ;;  %2182 = vmatpush3.bf16.msra.mxu0 %v990_v13 }
 0x250   : > { %2183 = vmatprep.subr.bf16.mxu0 %v1002_v16  ;;  %2195 = vmatprep.subr.bf16.mxu1 %v2314_v14 }
 0x253   : > { %2184 = vmatpush3.bf16.msra.mxu0 %v1002_v16 }
 0x254   : > { %2189 = vmatprep.subr.bf16.mxu0 %v2318_v60 }
 0x256   : > { %2178 = vmatmul.mubr.msk.bf16.vlgmr.msra.gmra.mrb[4].mxu1 %vm889_vm4, %v886_v17 }
 0x257   : > { %2196 = vmatpush3.bf16.msra.mxu1 %v2314_v14  ;;  %2199 = vmatprep.mubr.msk.bf16.mxu1 %vm622_vm2, %v2613_v53 }
 0x258   : > { %2197 = vmatprep.subr.bf16.mxu1 %v2315_v18 }
 0x25b   : > { %2198 = vmatpush3.bf16.msra.mxu1 %v2315_v18  ;;  %v2320_v18 = vld [vmem:[%s2532_s12 + $0x38] sm:$0xff]  }
 0x25c   : > { %2211 = vmatprep.subr.bf16.mxu1 %v2316_v19 }
 0x25e   : > { %2200 = vmatmul.mubr.msk.bf16.vlgmr.msra.gmra.mrb[8].mxu1 %vm622_vm2, %v2611_v52 }
 0x25f   : > { %2212 = vmatpush3.bf16.msra.mxu1 %v2316_v19  ;;  %2215 = vmatprep.mubr.msk.bf16.mxu1 %vm622_vm2, %v2613_v53 }
 0x260   : > { %2213 = vmatprep.subr.bf16.mxu1 %v2317_v20 }
 0x263   : > { %2214 = vmatpush3.bf16.msra.mxu1 %v2317_v20 }
 0x266   : > { %2216 = vmatmul.mubr.msk.bf16.vlgmr.msra.gmra.mrb[12].mxu1 %vm622_vm2, %v2611_v52 }
 0x329   : > { %v2179_v21 = vpop.f32.mrb[4].mxu1 }
 0x32a   : > { %v936_v22 = vpop.f32.mrb[5].mxu1  ;;  %v952_v26 = vmul.f32 0.25, %v2179_v21 }
 0x32b   : > { %v950_v23 = vmul.f32 0.25, %v936_v22  ;;  %v2180_v24 = vpop.f32.mrb[6].mxu1 }
 0x32c   : > { %v939_v25 = vpop.f32.mrb[7].mxu1  ;;  %v961_v31 = vsel %vm960_vm7, %v952_v26, -inf }
 0x32d   : > { %v951_v27 = vmul.f32 0.25, %v939_v25  ;;  %v954_v28 = vsel %vm953_vm6, %v950_v23, -inf }
 0x32e   : > { %955 = vmax.xlane.f32.xlu0 %v954_v28 }
 0x32f   : > { %v957_v29 = vsel %vm953_vm6, %v951_v27, -inf }
 0x330   : > { %958 = vmax.xlane.f32.xlu1 %v957_v29 }
 0x331   : > { %v2648_v30 = vpop.f32.mrb[8].mxu1 }
 0x332   : > { %962 = vmax.xlane.f32.xlu0 %v961_v31  ;;  %v2651_v32 = vpop.f32.mrb[9].mxu1  ;;  %v1321_v29 = vpack.c.bf16 %v2648_v30, %v2648_v30 }
 0x333   : > { %v2202_v33 = vpop.f32.mrb[10].mxu1 }
 0x334   : > { %v2653_v34 = vpop.f32.mrb[11].mxu1 }
 0x335   : > { %v1320_v35 = vpack.c.bf16 %v2653_v34, %v2651_v32 }
 0x339   : > { %v2217_v36 = vpop.f32.mrb[12].mxu1 }
 0x33a   : > { %v1306_v37 = vpop.f32.mrb[13].mxu1  ;;  %v1423_v38 = vpack.c.bf16 %v2217_v36, %v2217_v36 }
 0x33b   : > { %v2218_v39 = vpop.f32.mrb[14].mxu1 }
 0x33c   : > { %v1309_v40 = vpop.f32.mrb[15].mxu1  ;;  %v1431_v42 = vand.u32 %v1423_v38, %v1000_v11  ;;  %v2319_v11 = vld [vmem:[%s2532_s12 + $0x30] sm:$0xff]  }
 0x33d   : > { %v1422_v41 = vpack.c.bf16 %v1309_v40, %v1306_v37 }
 0x33f   : > { %2227 = vmatprep.subr.bf16.mxu1 %v1422_v41 }
 0x340   : > { %2228 = vmatpush3.bf16.msra.mxu1 %v1422_v41 }
 0x341   : > { %2229 = vmatprep.subr.bf16.mxu1 %v1431_v42 }
 0x344   : > { %2230 = vmatpush3.bf16.msra.mxu1 %v1431_v42 }
 0x3bb   : > { %v956_v43 = vpop.xlane.xlu0 %955 }
 0x3bc   : > { %v964_v44 = vsub.f32 %v950_v23, %v956_v43 }
 0x3bd   : > { %v959_v45 = vpop.xlane.xlu1 %958 }
 0x3be   : > { %v967_v46 = vmul.f32 1.442695, %v964_v44  ;;  %v965_v47 = vsub.f32 %v951_v27, %v959_v45 }
 0x3bf   : > { %v963_v48 = vpop.xlane.xlu0 %962 }
 0x3c0   : > { %2334 = vpow2.f32 %v967_v46  ;;  %v969_v49 = vmul.f32 1.442695, %v965_v47  ;;  %v966_v50 = vsub.f32 %v952_v26, %v963_v48 }
 0x3c2   : > { %2336 = vpow2.f32 %v969_v49  ;;  %v971_v51 = vmul.f32 1.442695, %v966_v50 }
 0x3c4   : > { %2338 = vpow2.f32 %v971_v51 }
 0x3ca   : > { %v2335_v54 = vpop.eup %2334 }
 0x3cb   : > { %v973_v55 = vsel %vm953_vm6, %v2335_v54, 0.0 }
 0x3cc   : > { %v2337_v56 = vpop.eup %2336  ;;  %974 = vadd.xlane.f32.xlu1 %v973_v55 }
 0x3cd   : > { %v976_v57 = vsel %vm953_vm6, %v2337_v56, 0.0 }
 0x3ce   : > { %v2339_v58 = vpop.eup %2338  ;;  %977 = vadd.xlane.f32.xlu0 %v976_v57  ;;  %v2321_v57 = vld [vmem:[%s2537_s15 + $0x8] sm:$0xff]  }
 0x3cf   : > { %v979_v59 = vsel %vm960_vm7, %v2339_v58, 0.0  ;;  %2235 = vmatprep.subr.bf16.mxu1 %v2321_v57 }
 0x3d0   : > { %980 = vadd.xlane.f32.xlu1 %v979_v59 }
 0x459   : > { %v975_v61 = vpop.xlane.xlu1 %974 }
 0x45a   : > { %2340 = vrcp.f32 %v975_v61 }
 0x45b   : > { %v978_v62 = vpop.xlane.xlu0 %977 }
 0x45c   : > { %2342 = vrcp.f32 %v978_v62 }
 0x45d   : > { %v981_v63 = vpop.xlane.xlu1 %980 }
 0x45e   : > { %2344 = vrcp.f32 %v981_v63 }
 0x464   : > { %v2341_v0 = vpop.eup %2340 }
 0x465   : > { %v985_v2 = vmul.f32 %v2341_v0, %v2335_v54 }
 0x466   : > { %v2343_v1 = vpop.eup %2342 }
 0x467   : > { %v986_v6 = vmul.f32 %v2343_v1, %v2337_v56 }
 0x468   : > { %v2345_v7 = vpop.eup %2344 }
 0x469   : > { %v987_v8 = vmul.f32 %v2345_v7, %v2339_v58  ;;  %v988_v9 = vpack.c.bf16 %v986_v6, %v985_v2 }
 0x46b   : > { %2185 = vmatprep.mubr.msk.bf16.mxu0 %vm953_vm6, %v988_v9  ;;  %v989_v10 = vpack.c.bf16 %v987_v8, %v987_v8 }
 0x46d   : > { %2186 = vmatmul.mubr.msk.bf16.vlgmr.msra.gmra.mrb[8].mxu0 %vm953_vm6, %v989_v10 }
 0x46e   : > { %2190 = vmatpush3.bf16.msra.mxu0 %v2318_v60 }
 0x46f   : > { %2203 = vmatprep.subr.bf16.mxu0 %v2319_v11 }
 0x540   : > { %v2187_v12 = vpop.f32.mrb[8].mxu0 }
 0x541   : > { %v1038_v13 = vpop.f32.mrb[9].mxu0  ;;  %v1053_v17 = vpack.c.bf16 %v2187_v12, %v2187_v12 }
 0x542   : > { %v2188_v14 = vpop.f32.mrb[10].mxu0 }
 0x543   : > { %v1041_v15 = vpop.f32.mrb[11].mxu0  ;;  %v2040_v14 = vld [vmem:[%s2814_s27] ss:$0 sm:$0xff] }
 0x544   : > { %v1052_v16 = vpack.c.bf16 %v1041_v15, %v1038_v13 }
 0x546   : > { %2191 = vmatprep.mubr.msk.bf16.mxu0 %vm889_vm4, %v1052_v16 }
 0x547   : > { %2192 = vmatmul.mubr.msk.bf16.vlgmr.msra.gmra.mrb[12].mxu0 %vm889_vm4, %v1053_v17 }
 0x548   : > { %2204 = vmatpush3.bf16.msra.mxu0 %v2319_v11  ;;  %2207 = vmatprep.mubr.msk.bf16.mxu0 %vm622_vm2, %v2613_v53 }
 0x549   : > { %2205 = vmatprep.subr.bf16.mxu0 %v2320_v18 }
 0x54c   : > { %2206 = vmatpush3.bf16.msra.mxu0 %v2320_v18 }
 0x54f   : > { %2208 = vmatmul.mubr.msk.bf16.vlgmr.msra.gmra.mrb[16].mxu0 %vm622_vm2, %v2611_v52 }
 0x550   : > { %2223 = vmatprep.mubr.msk.bf16.mxu0 %vm889_vm4, %v1320_v35 }
 0x61a   : > { %v2675_v19 = vpop.f32.mrb[12].mxu0 }
 0x61b   : > { %v2677_v20 = vpop.f32.mrb[13].mxu0  ;;  %v1124_v15 = vadd.f32 %v2675_v19, %v2040_v14 }
 0x61c   : > { %v2194_v21 = vpop.f32.mrb[14].mxu0  ;;  %v1122_v16 = vadd.f32 %v2040_v14, %v2677_v20 }
 0x61d   : > { %v2679_v22 = vpop.f32.mrb[15].mxu0 }
 0x622   : > { %v2209_v23 = vpop.f32.mrb[16].mxu0 }
 0x623   : > { %v1241_v24 = vpop.f32.mrb[17].mxu0  ;;  %v1323_v27 = vpack.c.bf16 %v2209_v23, %v2209_v23  ;;  %v1123_v23 = vadd.f32 %v2040_v14, %v2679_v22 }
 0x624   : > { %v2210_v53 = vpop.f32.mrb[18].mxu0 }
 0x625   : > { %v1244_v25 = vpop.f32.mrb[19].mxu0  ;;  %v1334_v28 = vsel %vm889_vm4, %v1323_v27, 0 }
 0x626   : > { %v1322_v26 = vpack.c.bf16 %v1244_v25, %v1241_v24 }
 0x628   : > { %v1331_v52 = vsel %vm889_vm4, %v1322_v26, 0  ;;  %2263 = vmatprep.subr.msk.bf16.mxu0 %vm889_vm4, %v1322_v26 }
 0x629   : > { %2220 = vmatpush3.bf16.xpose.msra.mxu0 %v1331_v52 }
 0x62a   : > { %2264 = vmatprep.subr.msk.bf16.mxu0 %vm889_vm4, %v1323_v27 }
 0x631   : > { %2222 = vmatpush3.bf16.xpose.msra.mxu0 %v1334_v28 }
 0x638   : > { %2224 = vmatmul.mubr.msk.bf16.vlgmr.msra.gmra.mrb[20].mxu0 %vm889_vm4, %v1321_v29 }
 0x70b   : > { %v2225_v31 = vpop.f32.mrb[20].mxu0 }
 0x70c   : > { %v1370_v32 = vpop.f32.mrb[21].mxu0  ;;  %v1386_v36 = vmul.f32 0.25, %v2225_v31 }
 0x70d   : > { %v1384_v33 = vmul.f32 0.25, %v1370_v32  ;;  %v2226_v34 = vpop.f32.mrb[22].mxu0 }
 0x70e   : > { %v1373_v35 = vpop.f32.mrb[23].mxu0  ;;  %v1393_v40 = vsel %vm960_vm7, %v1386_v36, -inf }
 0x70f   : > { %v1385_v37 = vmul.f32 0.25, %v1373_v35  ;;  %v1387_v38 = vsel %vm953_vm6, %v1384_v33, -inf }
 0x710   : > { %1388 = vmax.xlane.f32.xlu0 %v1387_v38 }
 0x711   : > { %v1390_v39 = vsel %vm953_vm6, %v1385_v37, -inf }
 0x712   : > { %1391 = vmax.xlane.f32.xlu1 %v1390_v39 }
 0x714   : > { %1394 = vmax.xlane.f32.xlu0 %v1393_v40 }
 0x79d   : > { %v1389_v41 = vpop.xlane.xlu0 %1388 }
 0x79e   : > { %v1396_v30 = vsub.f32 %v1384_v33, %v1389_v41 }
 0x79f   : > { %v1392_v42 = vpop.xlane.xlu1 %1391 }
 0x7a0   : > { %v1399_v43 = vmul.f32 1.442695, %v1396_v30  ;;  %v1397_v44 = vsub.f32 %v1385_v37, %v1392_v42  ;;  %v2322_v30 = vld [vmem:[%s2550_s25] sm:$0xff]   ;;  %v2323_v42 = vld [vmem:[%s2550_s25 + $0x8] sm:$0xff]   ;;  %s2815_s25 = scalar_lea.vmem %s2786_s6, %s2510_s28 }
 0x7a1   : > { %v1395_v45 = vpop.xlane.xlu0 %1394  ;;  %2241 = vmatprep.subr.bf16.mxu0 %v2322_v30 }
 0x7a2   : > { %2346 = vpow2.f32 %v1399_v43  ;;  %v1401_v46 = vmul.f32 1.442695, %v1397_v44  ;;  %v1398_v47 = vsub.f32 %v1386_v36, %v1395_v45  ;;  %2242 = vmatpush3.bf16.msra.mxu0 %v2322_v30 }
 0x7a3   : > { %2243 = vmatprep.subr.bf16.mxu0 %v2323_v42 }
 0x7a4   : > { %2348 = vpow2.f32 %v1401_v46  ;;  %v1403_v48 = vmul.f32 1.442695, %v1398_v47 }
 0x7a6   : > { %2350 = vpow2.f32 %v1403_v48  ;;  %2244 = vmatpush3.bf16.msra.mxu0 %v2323_v42 }
 0x7ac   : > { %v2347_v49 = vpop.eup %2346 }
 0x7ad   : > { %v1405_v50 = vsel %vm953_vm6, %v2347_v49, 0.0 }
 0x7ae   : > { %v2349_v51 = vpop.eup %2348  ;;  %1406 = vadd.xlane.f32.xlu1 %v1405_v50 }
 0x7af   : > { %v1408_v54 = vsel %vm953_vm6, %v2349_v51, 0.0 }
 0x7b0   : > { %v2351_v55 = vpop.eup %2350  ;;  %1409 = vadd.xlane.f32.xlu0 %v1408_v54 }
 0x7b1   : > { %v1411_v56 = vsel %vm960_vm7, %v2351_v55, 0.0 }
 0x7b2   : > { %1412 = vadd.xlane.f32.xlu1 %v1411_v56 }
 0x83b   : > { %v1407_v58 = vpop.xlane.xlu1 %1406 }
 0x83c   : > { %2352 = vrcp.f32 %v1407_v58 }
 0x83d   : > { %v1410_v59 = vpop.xlane.xlu0 %1409 }
 0x83e   : > { %2354 = vrcp.f32 %v1410_v59 }
 0x83f   : > { %v1413_v60 = vpop.xlane.xlu1 %1412 }
 0x840   : > { %2356 = vrcp.f32 %v1413_v60 }
 0x846   : > { %v2353_v61 = vpop.eup %2352 }
 0x847   : > { %v1417_v63 = vmul.f32 %v2353_v61, %v2347_v49  ;;  %v2075_v61 = vld [vmem:[%s2816_s14] ss:$0 sm:$0xff] }
 0x848   : > { %v2355_v62 = vpop.eup %2354 }
 0x849   : > { %v1418_v0 = vmul.f32 %v2355_v62, %v2349_v51 }
 0x84a   : > { %v2357_v1 = vpop.eup %2356 }
 0x84b   : > { %v1419_v2 = vmul.f32 %v2357_v1, %v2351_v55  ;;  %v1420_v6 = vpack.c.bf16 %v1418_v0, %v1417_v63  ;;  %v2074_v55 = vld [vmem:[%s2815_s25] ss:$0 sm:$0xff] }
 0x84d   : > { %2231 = vmatprep.mubr.msk.bf16.mxu1 %vm953_vm6, %v1420_v6  ;;  %v1421_v7 = vpack.c.bf16 %v1419_v2, %v1419_v2 }
 0x84f   : > { %2232 = vmatmul.mubr.msk.bf16.vlgmr.msra.gmra.mrb[16].mxu1 %vm953_vm6, %v1421_v7 }
 0x850   : > { %2236 = vmatpush3.bf16.msra.mxu1 %v2321_v57 }
 0x922   : > { %v2233_v8 = vpop.f32.mrb[16].mxu1 }
 0x923   : > { %v1467_v9 = vpop.f32.mrb[17].mxu1  ;;  %v1482_v13 = vpack.c.bf16 %v2233_v8, %v2233_v8 }
 0x924   : > { %v2234_v10 = vpop.f32.mrb[18].mxu1 }
 0x925   : > { %v1470_v11 = vpop.f32.mrb[19].mxu1  ;;  %v2325_v10 = vld [vmem:[%s2564_s18 + $0x8] sm:$0xff]  }
 0x926   : > { %v1481_v12 = vpack.c.bf16 %v1470_v11, %v1467_v9  ;;  %v2324_v9 = vld [vmem:[%s2564_s18] sm:$0xff]   ;;  %v2326_v11 = vld [vmem:[%s2564_s18 + $0x10] sm:$0xff]  }
 0x927   : > { %2249 = vmatprep.subr.bf16.mxu1 %v2324_v9 }
 0x928   : > { %2237 = vmatprep.mubr.msk.bf16.mxu1 %vm889_vm4, %v1481_v12  ;;  %v2327_v12 = vld [vmem:[%s2564_s18 + $0x18] sm:$0xff]  }
 0x929   : > { %2238 = vmatmul.mubr.msk.bf16.vlgmr.msra.gmra.mrb[20].mxu1 %vm889_vm4, %v1482_v13  ;;  %v2076_v13 = vld [vmem:[%s590_s22] ss:$0 sm:$0xff] }
 0x92a   : > { %2250 = vmatpush3.bf16.msra.mxu1 %v2324_v9 }
 0x92b   : > { %2251 = vmatprep.subr.bf16.mxu1 %v2325_v10 }
 0x92e   : > { %2252 = vmatpush3.bf16.msra.mxu1 %v2325_v10 }
 0x92f   : > { %2253 = vmatprep.subr.bf16.mxu1 %v2326_v11 }
 0x932   : > { %2254 = vmatpush3.bf16.msra.mxu1 %v2326_v11 }
 0x933   : > { %2255 = vmatprep.subr.bf16.mxu1 %v2327_v12 }
 0x936   : > { %2256 = vmatpush3.bf16.msra.mxu1 %v2327_v12 }
 0x9fc   : > { %v2239_v17 = vpop.f32.mrb[20].mxu1 }
 0x9fd   : > { %v1548_v18 = vadd.f32 %v2239_v17, %v1124_v15  ;;  %v1532_v21 = vpop.f32.mrb[21].mxu1 }
 0x9fe   : > { %v1546_v24 = vadd.f32 %v1532_v21, %v1122_v16  ;;  %v2240_v53 = vpop.f32.mrb[22].mxu1 }
 0x9ff   : > { %v1535_v25 = vpop.f32.mrb[23].mxu1  ;;  %v2711_v52 = vadd.f32 %v1548_v18, %v2579_v4 }
 0xa00   : > { %v2708_v26 = vadd.f32 %v1546_v24, %v2576_v3  ;;  %v1547_v27 = vadd.f32 %v1535_v25, %v1123_v23 }
 0xa01   : > { %v1560_v22 = vsel %vm629_vm3, %v2711_v52, 0.0 }
 0xa02   : > { %v2714_v28 = vadd.f32 %v1547_v27, %v2582_v5  ;;  %v1554_v19 = vsel %vm622_vm2, %v2708_v26, 0.0 }
 0xa03   : > { %1555 = vadd.xlane.f32.xlu0 %v1554_v19 }
 0xa04   : > { %v1557_v20 = vsel %vm622_vm2, %v2714_v28, 0.0 }
 0xa05   : > { %1558 = vadd.xlane.f32.xlu1 %v1557_v20 }
 0xa07   : > { %1561 = vadd.xlane.f32.xlu0 %v1560_v22 }
 0xa90   : > { %v1556_v3 = vpop.xlane.xlu0 %1555 }
 0xa91   : > { %v1563_v29 = vmul.f32 0.03125, %v1556_v3 }
 0xa92   : > { %v1559_v31 = vpop.xlane.xlu1 %1558 }
 0xa93   : > { %v1566_v4 = vsub.f32 %v2708_v26, %v1563_v29  ;;  %v1564_v5 = vmul.f32 0.03125, %v1559_v31 }
 0xa94   : > { %v1562_v32 = vpop.xlane.xlu0 %1561 }
 0xa95   : > { %v1567_v33 = vsub.f32 %v2714_v28, %v1564_v5  ;;  %v1565_v34 = vmul.f32 0.03125, %v1562_v32  ;;  %v1569_v35 = vmul.f32 %v1566_v4, %v1566_v4 }
 0xa97   : > { %v1568_v36 = vsub.f32 %v2711_v52, %v1565_v34  ;;  %v1572_v37 = vsel %vm622_vm2, %v1569_v35, 0.0  ;;  %v1570_v38 = vmul.f32 %v1567_v33, %v1567_v33 }
 0xa98   : > { %1573 = vadd.xlane.f32.xlu1 %v1572_v37 }
 0xa99   : > { %v1575_v39 = vsel %vm622_vm2, %v1570_v38, 0.0  ;;  %v1571_v40 = vmul.f32 %v1568_v36, %v1568_v36 }
 0xa9a   : > { %1576 = vadd.xlane.f32.xlu0 %v1575_v39 }
 0xa9b   : > { %v1578_v41 = vsel %vm629_vm3, %v1571_v40, 0.0 }
 0xa9c   : > { %1579 = vadd.xlane.f32.xlu1 %v1578_v41 }
 0xb25   : > { %v1574_v43 = vpop.xlane.xlu1 %1573 }
 0xb26   : > { %v1581_v44 = vmul.f32 0.03125, %v1574_v43 }
 0xb27   : > { %v1577_v45 = vpop.xlane.xlu0 %1576 }
 0xb28   : > { %v1584_v46 = vadd.f32 1e-05, %v1581_v44  ;;  %v1582_v47 = vmul.f32 0.03125, %v1577_v45 }
 0xb29   : > { %v1580_v48 = vpop.xlane.xlu1 %1579 }
 0xb2a   : > { %2358 = vrsqrt.f32 %v1584_v46  ;;  %v1585_v49 = vadd.f32 1e-05, %v1582_v47  ;;  %v1583_v50 = vmul.f32 0.03125, %v1580_v48  ;;  %v2081_v48 = vld [vmem:[%s598_s4] ss:$0 sm:$0xff] }
 0xb2c   : > { %2360 = vrsqrt.f32 %v1585_v49  ;;  %v1586_v51 = vadd.f32 1e-05, %v1583_v50 }
 0xb2e   : > { %2362 = vrsqrt.f32 %v1586_v51 }
 0xb34   : > { %v2359_v54 = vpop.eup %2358 }
 0xb35   : > { %v1590_v56 = vmul.f32 %v2359_v54, %v1566_v4 }
 0xb36   : > { %v2361_v57 = vpop.eup %2360 }
 0xb37   : > { %v1591_v58 = vmul.f32 %v2361_v57, %v1567_v33  ;;  %v1599_v59 = vmul.f32 %v2074_v55, %v1590_v56 }
 0xb38   : > { %v2363_v60 = vpop.eup %2362 }
 0xb39   : > { %v1592_v62 = vmul.f32 %v2363_v60, %v1568_v36  ;;  %v1600_v63 = vmul.f32 %v2074_v55, %v1591_v58  ;;  %v1608_v1 = vadd.f32 %v2075_v61, %v1599_v59 }
 0xb3b   : > { %v1601_v0 = vmul.f32 %v2074_v55, %v1592_v62  ;;  %v1609_v2 = vadd.f32 %v2075_v61, %v1600_v63 }
 0xb3d   : > { %v1611_v6 = vpack.c.bf16 %v1609_v2, %v1608_v1  ;;  %v1610_v7 = vadd.f32 %v2075_v61, %v1601_v0 }
 0xb3f   : > { %2245 = vmatprep.mubr.msk.bf16.mxu0 %vm622_vm2, %v1611_v6  ;;  %v1612_v8 = vpack.c.bf16 %v1610_v7, %v1610_v7 }
 0xb41   : > { %2246 = vmatmul.mubr.msk.bf16.vlgmr.msra.gmra.mrb[24].mxu0 %vm622_vm2, %v1612_v8 }
 0xc14   : > { %v2247_v14 = vpop.f32.mrb[24].mxu0 }
 0xc15   : > { %v1685_v15 = vadd.f32 %v2247_v14, %v2076_v13  ;;  %v1676_v16 = vpop.f32.mrb[25].mxu0 }
 0xc16   : > { %v1677_v17 = vadd.f32 %v2076_v13, %v1676_v16  ;;  %v2248_v18 = vpop.f32.mrb[26].mxu0 }
 0xc17   : > { %v1692_v21 = vmul.f32 %v1685_v15, %v1685_v15  ;;  %v1679_v23 = vpop.f32.mrb[27].mxu0 }
 0xc18   : > { %v1690_v24 = vmul.f32 %v1677_v17, %v1677_v17  ;;  %v1680_v53 = vadd.f32 %v2076_v13, %v1679_v23 }
 0xc19   : > { %v1695_v25 = vmul.f32 %v1692_v21, %v1685_v15 }
 0xc1a   : > { %v1693_v27 = vmul.f32 %v1690_v24, %v1677_v17  ;;  %v1691_v19 = vmul.f32 %v1680_v53, %v1680_v53 }
 0xc1b   : > { %v1698_v20 = vmul.f32 0.044715, %v1695_v25 }
 0xc1c   : > { %v1696_v22 = vmul.f32 0.044715, %v1693_v27  ;;  %v1694_v3 = vmul.f32 %v1691_v19, %v1680_v53 }
 0xc1d   : > { %v1701_v29 = vadd.f32 %v1698_v20, %v1685_v15 }
 0xc1e   : > { %v1699_v31 = vadd.f32 %v1696_v22, %v1677_v17  ;;  %v1697_v4 = vmul.f32 0.044715, %v1694_v3 }
 0xc1f   : > { %v1704_v5 = vmul.f32 0.7978846, %v1701_v29 }
 0xc20   : > { %v1702_v32 = vmul.f32 0.7978846, %v1699_v31  ;;  %v1700_v33 = vadd.f32 %v1697_v4, %v1680_v53 }
 0xc21   : > { %2364 = vtanh.f32 %v1704_v5 }
 0xc22   : > { %2366 = vtanh.f32 %v1702_v32  ;;  %v1703_v34 = vmul.f32 0.7978846, %v1700_v33 }
 0xc24   : > { %2368 = vtanh.f32 %v1703_v34 }
 0xc2b   : > { %v2365_v35 = vpop.eup %2364 }
 0xc2c   : > { %v2367_v36 = vpop.eup %2366  ;;  %v1710_v37 = vadd.f32 1.0, %v2365_v35 }
 0xc2d   : > { %v1708_v38 = vadd.f32 1.0, %v2367_v36 }
 0xc2e   : > { %v2369_v39 = vpop.eup %2368  ;;  %v1713_v40 = vmul.f32 0.5, %v1710_v37 }
 0xc2f   : > { %v1711_v41 = vmul.f32 0.5, %v1708_v38  ;;  %v1709_v30 = vadd.f32 1.0, %v2369_v39 }
 0xc30   : > { %v1716_v43 = vmul.f32 %v1713_v40, %v1685_v15 }
 0xc31   : > { %v1712_v42 = vmul.f32 0.5, %v1709_v30  ;;  %v1714_v44 = vmul.f32 %v1711_v41, %v1677_v17 }
 0xc32   : > { %v1718_v47 = vpack.c.bf16 %v1716_v43, %v1716_v43 }
 0xc33   : > { %v1715_v45 = vmul.f32 %v1712_v42, %v1680_v53 }
 0xc35   : > { %v1717_v46 = vpack.c.bf16 %v1715_v45, %v1714_v44 }
 0xc37   : > { %2257 = vmatprep.mubr.msk.bf16.mxu1 %vm1758_vm8, %v1717_v46 }
 0xc38   : > { %2258 = vmatmul.mubr.msk.bf16.vlgmr.msra.gmra.mrb[24].mxu1 %vm1758_vm8, %v1718_v47 }
 0xd0b   : > { %v2259_v49 = vpop.f32.mrb[24].mxu1 }
 0xd0c   : > { %v1808_v50 = vadd.f32 %v2259_v49, %v2081_v48  ;;  %v1799_v51 = vpop.f32.mrb[25].mxu1 }
 0xd0d   : > { %v1800_v54 = vadd.f32 %v2081_v48, %v1799_v51  ;;  %v2260_v55 = vpop.f32.mrb[26].mxu1 }
 0xd0e   : > { %v1815_v56 = vadd.f32 %v1808_v50, %v2711_v52  ;;  %v1802_v57 = vpop.f32.mrb[27].mxu1 }
 0xd0f   : > { %v1813_v58 = vadd.f32 %v1800_v54, %v2708_v26  ;;  %v1803_v59 = vadd.f32 %v2081_v48, %v1802_v57 }
 0xd10   : > { %1818 = vst.msk [vmem:[%s2569_s23 + $0x10] sm:$0x1] %vm629_vm3, %v1815_v56 }
 0xd11   : > { %1816 = vst.msk [vmem:[%s2569_s23] sm:$0xff] %vm622_vm2, %v1813_v58  ;;  %v1814_v60 = vadd.f32 %v1803_v59, %v2714_v28 }
 0xd13   : > { %1817 = vst.msk [vmem:[%s2569_s23 + $0x8] sm:$0xff] %vm622_vm2, %v1814_v60 }
 0xd14 PF: > { %s2817_s4 = sld [smem:[#allocation5_spill]]  ;;  %s2818_s21 = sld [smem:[#allocation3_spill]] }
 0xd15   : > { %s2819_s22 = sld [smem:[#allocation4_spill]]  ;;  %s2820_s23 = sld [smem:[#allocation6_spill]] }
 0xd16   : > { %s2821_s24 = sld [smem:[#allocation7_spill]] }
 0xd1a   : > { %s22_s25 = sadd.s32 1, %s2817_s4  }
 0xd1b   : > { %p19_p8 = scmp.ge.s32.totalorder %s22_s25, 6  }
 0xd1d   :  { %21 = sbr.rel (!%p19_p8) target bundleno = 5 (0x5), region = 141 }

</bundles_post_ra>
